<compile_context>
chip_gen: v7x
topology: tpu7x:2x2x1
jax: 0.10.0
libtpu: 0.0.40
codegen_flags: <defaults>
</compile_context>

<pallas_src>
import math

import jax
import jax.numpy as jnp
from jax.experimental import pallas as pl
from jax.experimental.pallas import tpu as pltpu

# ---- small, module-consistent shapes -------------------------------------------------
C = 16            # channels
REDUCE = 0.25     # reduce
CR = int(C * REDUCE)              # reduced channels = 4
S = 4             # num_sample
N = 16            # number of positions (conv1d length)
B = 2             # batch
O1 = int(2 * C * REDUCE * C)      # net1 out-channels = 2 * C * CR = 128
LN_EPS = 1e-5
BN_EPS = 1e-5


# ---- Pallas kernel: single grid step over the whole (B-collapsed) problem -------------
def dynamic_interaction_kernel(
    feat_ref,   # (B, C, N)            features, native PyTorch layout
    pre_ref,    # (S*B*N, C)           pre_features, channel-last, row = s*B*N + b*N + n
    prm_ref,    # (C + 8 + S*C, 2*C*CR)  packed params:
                #   rows [0, C)           : fused, BN-folded net1 weight (first half
                #                           column-permuted to (r*C + c) lane layout)
                #   row  C                : fused net1 bias
                #   rows C+1 / C+2        : LN1 gamma / beta      (lanes [0, CR))
                #   rows C+3 / C+4        : LN2 gamma / beta      (lanes [0, C))
                #   row  C+5              : folded net2 bias      (lanes [0, C))
                #   rows [C+8, C+8+S*C)   : BN-folded net2 weight^T, lanes [0, C) valid
    out_ref,    # (B, C, N)
):
    b_, c_, n_ = feat_ref.shape
    sbn, _ = pre_ref.shape
    bn = b_ * n_
    s_ = sbn // bn
    o1 = prm_ref.shape[1]
    cr = o1 // (2 * c_)
    hi = jax.lax.Precision.HIGHEST

    # (B, C, N) -> (B*N, C): two in-kernel 16x16 transposes (XLU), no wrapper transpose.
    feat = feat_ref[...]
    featT = jnp.concatenate([feat[i].T for i in range(b_)], axis=0)        # (BN, C)

    # Parameter slab slices (all row ranges are 8-aligned, full 128-lane width).
    w1 = prm_ref[0:c_, :]                                                  # (C, 2*C*CR)
    pv = prm_ref[c_:c_ + 8, :]                                             # (8, 2*C*CR)
    w2 = prm_ref[c_ + 8:c_ + 8 + s_ * c_, :]                               # (S*C, 128)

    # --- net1: single fused 1x1 conv + folded BN + ReLU, 128 lanes out (lane-dense)
    dyn = jnp.maximum(
        jnp.dot(featT, w1, precision=hi,
                preferred_element_type=jnp.float32) + pv[0:1, :], 0.0)     # (BN, 2*C*CR)

    # Tile dyn rows S times so its row layout matches pre's (row = s*BN + bn).
    dyn_t = jnp.concatenate([dyn] * s_, axis=0)                            # (S*BN, 2*C*CR)
    dyn1 = dyn_t[:, :cr * c_]       # lane = r*C + c   (param1, columns permuted in glue)
    dyn2 = dyn_t[:, cr * c_:]       # lane = r*C + c'  (param2, native layout)

    pre = pre_ref[...]                                                     # (S*BN, C)

    # --- tmp1[row, r] = sum_c pre[row, c] * param1[row, c, r]  -> CR lane-reduces
    tmp1 = jnp.concatenate(
        [jnp.sum(pre * dyn1[:, r * c_:(r + 1) * c_], axis=-1, keepdims=True)
         for r in range(cr)], axis=-1)                                     # (S*BN, CR)

    # LayerNorm over CR + ReLU (relu1)
    m1 = jnp.mean(tmp1, axis=-1, keepdims=True)
    v1 = jnp.mean((tmp1 - m1) ** 2, axis=-1, keepdims=True)
    tmp1 = (tmp1 - m1) * jax.lax.rsqrt(v1 + LN_EPS) * pv[1:2, :cr] + pv[2:3, :cr]
    tmp1 = jnp.maximum(tmp1, 0.0)

    # --- tmp2[row, c'] = sum_r tmp1[row, r] * param2[row, r, c']  -> CR broadcast-MACs
    tmp2 = tmp1[:, 0:1] * dyn2[:, 0:c_]
    for r in range(1, cr):
        tmp2 = tmp2 + tmp1[:, r:r + 1] * dyn2[:, r * c_:(r + 1) * c_]      # (S*BN, C)

    # LayerNorm over C + ReLU (relu2)
    m2 = jnp.mean(tmp2, axis=-1, keepdims=True)
    v2 = jnp.mean((tmp2 - m2) ** 2, axis=-1, keepdims=True)
    tmp2 = (tmp2 - m2) * jax.lax.rsqrt(v2 + LN_EPS) * pv[3:4, :c_] + pv[4:5, :c_]
    tmp2 = jnp.maximum(tmp2, 0.0)

    # Regroup rows (s, bn) -> lanes (s*C + c): lane-concat of S aligned sublane slices.
    tmp2_cat = jnp.concatenate(
        [tmp2[s * bn:(s + 1) * bn, :] for s in range(s_)], axis=-1)        # (BN, S*C)

    # --- net2: ONE (BN, S*C) @ (S*C, 128) matmul (zero-padded lanes), + bias + ReLU
    out2_full = jnp.dot(tmp2_cat, w2, precision=hi,
                        preferred_element_type=jnp.float32)                # (BN, 128)
    out2 = jnp.maximum(out2_full[:, :c_] + pv[5:6, :c_], 0.0)              # (BN, C)

    # residual add + final ReLU (relu3), emitted directly in (B, C, N) layout
    res = jnp.maximum(out2 + featT, 0.0)                                   # (BN, C)
    for i in range(b_):
        out_ref[i] = res[i * n_:(i + 1) * n_, :].T                         # (C, N)


# ---- wrapper: BN folding, weight permutation/fusion, param packing, pallas_call -------
def _dynamic_interaction_impl(features, pre_features, params):
    Bn, Cn, Nn = features.shape
    Sn = pre_features.shape[-1]
    CRn = params["ln1_gamma"].shape[0]
    O1n = 2 * Cn * CRn

    # fold eval-mode BatchNorm1d into the 1x1 convolutions
    s1 = params["bn1_gamma"] * jax.lax.rsqrt(params["bn1_var"] + BN_EPS)
    sh1 = params["bn1_beta"] - params["bn1_mean"] * s1
    W1_eff = params["w1"] * s1[:, None]                    # (O1, C)
    s2 = params["bn2_gamma"] * jax.lax.rsqrt(params["bn2_var"] + BN_EPS)
    sh2 = params["bn2_beta"] - params["bn2_mean"] * s2
    W2_eff = params["w2"] * s2[:, None]                    # (C, S*C)

    split = Cn * CRn
    # param1 half: permute out-channels from (c*CR + r) to (r*C + c) so both halves
    # share the same lane layout and the kernel can slice them from one matmul result.
    w1a = jnp.transpose(W1_eff[:split].reshape(Cn, CRn, Cn), (1, 0, 2)).reshape(split, Cn)
    b1a = jnp.transpose(sh1[:split].reshape(Cn, CRn), (1, 0)).reshape(split)
    w1b = W1_eff[split:]                                   # already (r*C + c')
    b1b = sh1[split:]
    w1_cat = jnp.concatenate([w1a, w1b], axis=0).T         # (C, 2*C*CR) = (16, 128)
    b1_cat = jnp.concatenate([b1a, b1b], axis=0)           # (2*C*CR,)

    # Pack ALL parameters into one (C + 8 + S*C, 128) slab -> a single input DMA.
    rows = Cn + 8 + Sn * Cn                                # 16 + 8 + 64 = 88 (8-aligned)
    prm = jnp.zeros((rows, O1n), jnp.float32)
    prm = prm.at[:Cn, :].set(w1_cat)                       # fused net1 weight
    prm = prm.at[Cn, :].set(b1_cat)                        # fused net1 bias
    prm = prm.at[Cn + 1, :CRn].set(params["ln1_gamma"])
    prm = prm.at[Cn + 2, :CRn].set(params["ln1_beta"])
    prm = prm.at[Cn + 3, :Cn].set(params["ln2_gamma"])
    prm = prm.at[Cn + 4, :Cn].set(params["ln2_beta"])
    prm = prm.at[Cn + 5, :Cn].set(sh2)                     # folded net2 bias
    prm = prm.at[Cn + 8:, :Cn].set(W2_eff.T)               # net2 weight^T, lane-padded

    # pre_features (B, C, N, S) -> (S*B*N, C): one small channel-last permute in XLA.
    # (s-major row order keeps the in-kernel dyn expansion a whole-block concat.)
    pre_flat = jnp.transpose(pre_features, (3, 0, 2, 1)).reshape(Sn * Bn * Nn, Cn)

    # Single grid step: whole problem (~10 KiB activations + 45 KiB params) in VMEM;
    # collapsing the grid removes per-step pipeline overhead (dominant at these shapes).
    return pl.pallas_call(
        dynamic_interaction_kernel,
        out_shape=jax.ShapeDtypeStruct((Bn, Cn, Nn), jnp.float32),
        grid=(1,),
        in_specs=[
            pl.BlockSpec((Bn, Cn, Nn), lambda i: (0, 0, 0)),          # features (B,C,N)
            pl.BlockSpec((Sn * Bn * Nn, Cn), lambda i: (0, 0)),       # pre (S*B*N, C)
            pl.BlockSpec((rows, O1n), lambda i: (0, 0)),              # packed parameters
        ],
        out_specs=pl.BlockSpec((Bn, Cn, Nn), lambda i: (0, 0, 0)),
        compiler_params=pltpu.CompilerParams(dimension_semantics=("arbitrary",)),
    )(features, pre_flat, prm)


dynamic_interaction = jax.jit(_dynamic_interaction_impl)


# ---- pure-JAX reference (mirrors the PyTorch forward, unfused BN) ----------------------
def _layer_norm(x, gamma, beta, eps=LN_EPS):
    m = jnp.mean(x, axis=-1, keepdims=True)
    v = jnp.mean((x - m) ** 2, axis=-1, keepdims=True)
    return (x - m) * jax.lax.rsqrt(v + eps) * gamma + beta


def reference(features, pre_features, params):
    hi = jax.lax.Precision.HIGHEST
    Bn, Cn, Nn = features.shape
    CRn = params["ln1_gamma"].shape[0]

    featT = jnp.transpose(features, (0, 2, 1))                            # (B, N, C)
    dyn = jnp.einsum("bnk,ok->bno", featT, params["w1"], precision=hi)
    s1 = params["bn1_gamma"] / jnp.sqrt(params["bn1_var"] + BN_EPS)
    dyn = jnp.maximum((dyn - params["bn1_mean"]) * s1 + params["bn1_beta"], 0.0)
    p1 = dyn[..., : Cn * CRn].reshape(Bn, Nn, Cn, CRn)
    p2 = dyn[..., Cn * CRn:].reshape(Bn, Nn, CRn, Cn)
    pre = jnp.transpose(pre_features, (0, 2, 3, 1))                       # (B, N, S, C)
    t1 = jnp.einsum("bnsc,bncr->bnsr", pre, p1, precision=hi)
    t1 = jnp.maximum(_layer_norm(t1, params["ln1_gamma"], params["ln1_beta"]), 0.0)
    t2 = jnp.einsum("bnsr,bnrc->bnsc", t1, p2, precision=hi)
    t2 = jnp.maximum(_layer_norm(t2, params["ln2_gamma"], params["ln2_beta"]), 0.0)
    flat = t2.reshape(Bn, Nn, -1)
    o2 = jnp.einsum("bnk,ok->bno", flat, params["w2"], precision=hi)
    s2 = params["bn2_gamma"] / jnp.sqrt(params["bn2_var"] + BN_EPS)
    o2 = jnp.maximum((o2 - params["bn2_mean"]) * s2 + params["bn2_beta"], 0.0)
    out = jnp.maximum(o2 + featT, 0.0)
    return jnp.transpose(out, (0, 2, 1))


if __name__ == "__main__":
    key = jax.random.PRNGKey(0)
    keys = jax.random.split(key, 16)

    # deterministic synthetic parameters (shapes from DynamicInteraction.__init__)
    params = dict(
        w1=jax.random.normal(keys[0], (O1, C), jnp.float32) / math.sqrt(C),
        bn1_gamma=1.0 + 0.1 * jax.random.normal(keys[1], (O1,), jnp.float32),
        bn1_beta=0.1 * jax.random.normal(keys[2], (O1,), jnp.float32),
        bn1_mean=0.1 * jax.random.normal(keys[3], (O1,), jnp.float32),
        bn1_var=jnp.abs(1.0 + 0.1 * jax.random.normal(keys[4], (O1,), jnp.float32)),
        ln1_gamma=1.0 + 0.1 * jax.random.normal(keys[5], (CR,), jnp.float32),
        ln1_beta=0.1 * jax.random.normal(keys[6], (CR,), jnp.float32),
        ln2_gamma=1.0 + 0.1 * jax.random.normal(keys[7], (C,), jnp.float32),
        ln2_beta=0.1 * jax.random.normal(keys[8], (C,), jnp.float32),
        w2=jax.random.normal(keys[9], (C, S * C), jnp.float32) / math.sqrt(S * C),
        bn2_gamma=1.0 + 0.1 * jax.random.normal(keys[10], (C,), jnp.float32),
        bn2_beta=0.1 * jax.random.normal(keys[11], (C,), jnp.float32),
        bn2_mean=0.1 * jax.random.normal(keys[12], (C,), jnp.float32),
        bn2_var=jnp.abs(1.0 + 0.1 * jax.random.normal(keys[13], (C,), jnp.float32)),
    )

    features = jax.random.normal(keys[14], (B, C, N), jnp.float32)          # (B, C, N)
    pre_features = jax.random.normal(keys[15], (B, C, N, S), jnp.float32)   # (B, C, N, S)

    out = dynamic_interaction(features, pre_features, params)
    out = jax.block_until_ready(out)

    ref = reference(features, pre_features, params)
    assert out.shape == (B, C, N)
    if not jnp.allclose(out, ref, atol=1e-2, rtol=1e-2):
        raise AssertionError(
            f"mismatch vs reference, max abs err = {jnp.max(jnp.abs(out - ref))}")
    print("KERNEL_OK")
</pallas_src>

<mosaic_0001>
module attributes {stable_mosaic.version = 11 : i64} {
  func.func @dynamic_interaction_kernel(%arg0: i32, %arg1: memref<2x16x16xf32, #tpu.memory_space<vmem>>, %arg2: memref<128x16xf32, #tpu.memory_space<vmem>>, %arg3: memref<88x128xf32, #tpu.memory_space<vmem>>, %arg4: memref<2x16x16xf32, #tpu.memory_space<vmem>>) attributes {dimension_semantics = [#tpu.dimension_semantics<arbitrary>], iteration_bounds = array<i64: 1>, scalar_prefetch = 0 : i64, scratch_operands = 0 : i64, tpu.core_type = #tpu.core_type<tc>, window_params = [{pipeline_mode = #tpu.pipeline_mode<synchronous>, transform_indices = @transform_0, window_bounds = array<i64: 2, 16, 16>}, {pipeline_mode = #tpu.pipeline_mode<synchronous>, transform_indices = @transform_1, window_bounds = array<i64: 128, 16>}, {pipeline_mode = #tpu.pipeline_mode<synchronous>, transform_indices = @transform_2, window_bounds = array<i64: 88, 128>}, {pipeline_mode = #tpu.pipeline_mode<synchronous>, transform_indices = @transform_3, window_bounds = array<i64: 2, 16, 16>}]} {
    %c0 = arith.constant 0 : index
    %c0_0 = arith.constant 0 : index
    %c0_1 = arith.constant 0 : index
    %0 = vector.load %arg1[%c0, %c0_0, %c0_1] : memref<2x16x16xf32, #tpu.memory_space<vmem>>, vector<2x16x16xf32>
    %1 = vector.extract_strided_slice %0 {offsets = [0, 0, 0], sizes = [1, 16, 16], strides = [1, 1, 1]} : vector<2x16x16xf32> to vector<1x16x16xf32>
    %2 = vector.shape_cast %1 : vector<1x16x16xf32> to vector<16x16xf32>
    %3 = tpu.transpose %2, [1, 0] : vector<16x16xf32> -> vector<16x16xf32>
    %4 = vector.extract_strided_slice %0 {offsets = [1, 0, 0], sizes = [1, 16, 16], strides = [1, 1, 1]} : vector<2x16x16xf32> to vector<1x16x16xf32>
    %5 = vector.shape_cast %4 : vector<1x16x16xf32> to vector<16x16xf32>
    %6 = tpu.transpose %5, [1, 0] : vector<16x16xf32> -> vector<16x16xf32>
    %7 = tpu.concatenate %3, %6 in 0 : vector<16x16xf32>, vector<16x16xf32> -> vector<32x16xf32>
    %c0_2 = arith.constant 0 : index
    %c0_3 = arith.constant 0 : index
    %8 = vector.load %arg3[%c0_2, %c0_3] : memref<88x128xf32, #tpu.memory_space<vmem>>, vector<16x128xf32>
    %c16 = arith.constant 16 : index
    %c0_4 = arith.constant 0 : index
    %9 = vector.load %arg3[%c16, %c0_4] : memref<88x128xf32, #tpu.memory_space<vmem>>, vector<8x128xf32>
    %c24 = arith.constant 24 : index
    %c0_5 = arith.constant 0 : index
    %10 = vector.load %arg3[%c24, %c0_5] : memref<88x128xf32, #tpu.memory_space<vmem>>, vector<64x128xf32>
    %cst = arith.constant dense<0.000000e+00> : vector<32x128xf32>
    %11 = tpu.matmul %7, %8, %cst {dimension_numbers = #tpu.dot_dimension_numbers<[1], [0], [0], [1], [0, 0, 1, 1], [], []>, precision = #tpu.contract_precision<fp32>} : vector<32x16xf32>, vector<16x128xf32>, vector<32x128xf32> -> vector<32x128xf32>
    %12 = vector.extract_strided_slice %9 {offsets = [0, 0], sizes = [1, 128], strides = [1, 1]} : vector<8x128xf32> to vector<1x128xf32>
    %13 = vector.broadcast %12 : vector<1x128xf32> to vector<32x128xf32>
    %14 = arith.addf %11, %13 : vector<32x128xf32>
    %cst_6 = arith.constant 0.000000e+00 : f32
    %15 = vector.broadcast %cst_6 : f32 to vector<32x128xf32>
    %16 = arith.maximumf %14, %15 : vector<32x128xf32>
    %17 = tpu.concatenate %16, %16, %16, %16 in 0 : vector<32x128xf32>, vector<32x128xf32>, vector<32x128xf32>, vector<32x128xf32> -> vector<128x128xf32>
    %18 = vector.extract_strided_slice %17 {offsets = [0, 0], sizes = [128, 64], strides = [1, 1]} : vector<128x128xf32> to vector<128x64xf32>
    %19 = vector.extract_strided_slice %17 {offsets = [0, 64], sizes = [128, 64], strides = [1, 1]} : vector<128x128xf32> to vector<128x64xf32>
    %c0_7 = arith.constant 0 : index
    %c0_8 = arith.constant 0 : index
    %20 = vector.load %arg2[%c0_7, %c0_8] : memref<128x16xf32, #tpu.memory_space<vmem>>, vector<128x16xf32>
    %21 = vector.extract_strided_slice %18 {offsets = [0, 0], sizes = [128, 16], strides = [1, 1]} : vector<128x64xf32> to vector<128x16xf32>
    %22 = arith.mulf %20, %21 : vector<128x16xf32>
    %cst_9 = arith.constant dense<0.000000e+00> : vector<128xf32>
    %23 = vector.multi_reduction <add>, %22, %cst_9 [1] : vector<128x16xf32> to vector<128xf32>
    %24 = vector.shape_cast %23 : vector<128xf32> to vector<128x1xf32>
    %25 = vector.extract_strided_slice %18 {offsets = [0, 16], sizes = [128, 16], strides = [1, 1]} : vector<128x64xf32> to vector<128x16xf32>
    %26 = arith.mulf %20, %25 : vector<128x16xf32>
    %cst_10 = arith.constant dense<0.000000e+00> : vector<128xf32>
    %27 = vector.multi_reduction <add>, %26, %cst_10 [1] : vector<128x16xf32> to vector<128xf32>
    %28 = vector.shape_cast %27 : vector<128xf32> to vector<128x1xf32>
    %29 = vector.extract_strided_slice %18 {offsets = [0, 32], sizes = [128, 16], strides = [1, 1]} : vector<128x64xf32> to vector<128x16xf32>
    %30 = arith.mulf %20, %29 : vector<128x16xf32>
    %cst_11 = arith.constant dense<0.000000e+00> : vector<128xf32>
    %31 = vector.multi_reduction <add>, %30, %cst_11 [1] : vector<128x16xf32> to vector<128xf32>
    %32 = vector.shape_cast %31 : vector<128xf32> to vector<128x1xf32>
    %33 = vector.extract_strided_slice %18 {offsets = [0, 48], sizes = [128, 16], strides = [1, 1]} : vector<128x64xf32> to vector<128x16xf32>
    %34 = arith.mulf %20, %33 : vector<128x16xf32>
    %cst_12 = arith.constant dense<0.000000e+00> : vector<128xf32>
    %35 = vector.multi_reduction <add>, %34, %cst_12 [1] : vector<128x16xf32> to vector<128xf32>
    %36 = vector.shape_cast %35 : vector<128xf32> to vector<128x1xf32>
    %37 = tpu.concatenate %24, %28, %32, %36 in 1 : vector<128x1xf32>, vector<128x1xf32>, vector<128x1xf32>, vector<128x1xf32> -> vector<128x4xf32>
    %cst_13 = arith.constant dense<0.000000e+00> : vector<128xf32>
    %38 = vector.multi_reduction <add>, %37, %cst_13 [1] : vector<128x4xf32> to vector<128xf32>
    %39 = vector.shape_cast %38 : vector<128xf32> to vector<128x1xf32>
    %cst_14 = arith.constant 4.000000e+00 : f32
    %40 = vector.broadcast %cst_14 : f32 to vector<128x1xf32>
    %41 = arith.divf %39, %40 : vector<128x1xf32>
    %42 = vector.broadcast %41 : vector<128x1xf32> to vector<128x4xf32>
    %43 = arith.subf %37, %42 : vector<128x4xf32>
    %44 = arith.mulf %43, %43 : vector<128x4xf32>
    %cst_15 = arith.constant dense<0.000000e+00> : vector<128xf32>
    %45 = vector.multi_reduction <add>, %44, %cst_15 [1] : vector<128x4xf32> to vector<128xf32>
    %46 = vector.shape_cast %45 : vector<128xf32> to vector<128x1xf32>
    %cst_16 = arith.constant 4.000000e+00 : f32
    %47 = vector.broadcast %cst_16 : f32 to vector<128x1xf32>
    %48 = arith.divf %46, %47 : vector<128x1xf32>
    %49 = vector.broadcast %41 : vector<128x1xf32> to vector<128x4xf32>
    %50 = arith.subf %37, %49 : vector<128x4xf32>
    %cst_17 = arith.constant 9.99999974E-6 : f32
    %51 = vector.broadcast %cst_17 : f32 to vector<128x1xf32>
    %52 = arith.addf %48, %51 : vector<128x1xf32>
    %53 = math.rsqrt %52 : vector<128x1xf32>
    %54 = vector.broadcast %53 : vector<128x1xf32> to vector<128x4xf32>
    %55 = arith.mulf %50, %54 : vector<128x4xf32>
    %56 = vector.extract_strided_slice %9 {offsets = [1, 0], sizes = [1, 4], strides = [1, 1]} : vector<8x128xf32> to vector<1x4xf32>
    %57 = vector.broadcast %56 : vector<1x4xf32> to vector<128x4xf32>
    %58 = arith.mulf %55, %57 : vector<128x4xf32>
    %59 = vector.extract_strided_slice %9 {offsets = [2, 0], sizes = [1, 4], strides = [1, 1]} : vector<8x128xf32> to vector<1x4xf32>
    %60 = vector.broadcast %59 : vector<1x4xf32> to vector<128x4xf32>
    %61 = arith.addf %58, %60 : vector<128x4xf32>
    %cst_18 = arith.constant 0.000000e+00 : f32
    %62 = vector.broadcast %cst_18 : f32 to vector<128x4xf32>
    %63 = arith.maximumf %61, %62 : vector<128x4xf32>
    %64 = vector.extract_strided_slice %63 {offsets = [0, 0], sizes = [128, 1], strides = [1, 1]} : vector<128x4xf32> to vector<128x1xf32>
    %65 = vector.extract_strided_slice %19 {offsets = [0, 0], sizes = [128, 16], strides = [1, 1]} : vector<128x64xf32> to vector<128x16xf32>
    %66 = vector.broadcast %64 : vector<128x1xf32> to vector<128x16xf32>
    %67 = arith.mulf %66, %65 : vector<128x16xf32>
    %68 = vector.extract_strided_slice %63 {offsets = [0, 1], sizes = [128, 1], strides = [1, 1]} : vector<128x4xf32> to vector<128x1xf32>
    %69 = vector.extract_strided_slice %19 {offsets = [0, 16], sizes = [128, 16], strides = [1, 1]} : vector<128x64xf32> to vector<128x16xf32>
    %70 = vector.broadcast %68 : vector<128x1xf32> to vector<128x16xf32>
    %71 = arith.mulf %70, %69 : vector<128x16xf32>
    %72 = arith.addf %67, %71 : vector<128x16xf32>
    %73 = vector.extract_strided_slice %63 {offsets = [0, 2], sizes = [128, 1], strides = [1, 1]} : vector<128x4xf32> to vector<128x1xf32>
    %74 = vector.extract_strided_slice %19 {offsets = [0, 32], sizes = [128, 16], strides = [1, 1]} : vector<128x64xf32> to vector<128x16xf32>
    %75 = vector.broadcast %73 : vector<128x1xf32> to vector<128x16xf32>
    %76 = arith.mulf %75, %74 : vector<128x16xf32>
    %77 = arith.addf %72, %76 : vector<128x16xf32>
    %78 = vector.extract_strided_slice %63 {offsets = [0, 3], sizes = [128, 1], strides = [1, 1]} : vector<128x4xf32> to vector<128x1xf32>
    %79 = vector.extract_strided_slice %19 {offsets = [0, 48], sizes = [128, 16], strides = [1, 1]} : vector<128x64xf32> to vector<128x16xf32>
    %80 = vector.broadcast %78 : vector<128x1xf32> to vector<128x16xf32>
    %81 = arith.mulf %80, %79 : vector<128x16xf32>
    %82 = arith.addf %77, %81 : vector<128x16xf32>
    %cst_19 = arith.constant dense<0.000000e+00> : vector<128xf32>
    %83 = vector.multi_reduction <add>, %82, %cst_19 [1] : vector<128x16xf32> to vector<128xf32>
    %84 = vector.shape_cast %83 : vector<128xf32> to vector<128x1xf32>
    %cst_20 = arith.constant 1.600000e+01 : f32
    %85 = vector.broadcast %cst_20 : f32 to vector<128x1xf32>
    %86 = arith.divf %84, %85 : vector<128x1xf32>
    %87 = vector.broadcast %86 : vector<128x1xf32> to vector<128x16xf32>
    %88 = arith.subf %82, %87 : vector<128x16xf32>
    %89 = arith.mulf %88, %88 : vector<128x16xf32>
    %cst_21 = arith.constant dense<0.000000e+00> : vector<128xf32>
    %90 = vector.multi_reduction <add>, %89, %cst_21 [1] : vector<128x16xf32> to vector<128xf32>
    %91 = vector.shape_cast %90 : vector<128xf32> to vector<128x1xf32>
    %cst_22 = arith.constant 1.600000e+01 : f32
    %92 = vector.broadcast %cst_22 : f32 to vector<128x1xf32>
    %93 = arith.divf %91, %92 : vector<128x1xf32>
    %94 = vector.broadcast %86 : vector<128x1xf32> to vector<128x16xf32>
    %95 = arith.subf %82, %94 : vector<128x16xf32>
    %cst_23 = arith.constant 9.99999974E-6 : f32
    %96 = vector.broadcast %cst_23 : f32 to vector<128x1xf32>
    %97 = arith.addf %93, %96 : vector<128x1xf32>
    %98 = math.rsqrt %97 : vector<128x1xf32>
    %99 = vector.broadcast %98 : vector<128x1xf32> to vector<128x16xf32>
    %100 = arith.mulf %95, %99 : vector<128x16xf32>
    %101 = vector.extract_strided_slice %9 {offsets = [3, 0], sizes = [1, 16], strides = [1, 1]} : vector<8x128xf32> to vector<1x16xf32>
    %102 = vector.broadcast %101 : vector<1x16xf32> to vector<128x16xf32>
    %103 = arith.mulf %100, %102 : vector<128x16xf32>
    %104 = vector.extract_strided_slice %9 {offsets = [4, 0], sizes = [1, 16], strides = [1, 1]} : vector<8x128xf32> to vector<1x16xf32>
    %105 = vector.broadcast %104 : vector<1x16xf32> to vector<128x16xf32>
    %106 = arith.addf %103, %105 : vector<128x16xf32>
    %cst_24 = arith.constant 0.000000e+00 : f32
    %107 = vector.broadcast %cst_24 : f32 to vector<128x16xf32>
    %108 = arith.maximumf %106, %107 : vector<128x16xf32>
    %109 = vector.extract_strided_slice %108 {offsets = [0, 0], sizes = [32, 16], strides = [1, 1]} : vector<128x16xf32> to vector<32x16xf32>
    %110 = vector.extract_strided_slice %108 {offsets = [32, 0], sizes = [32, 16], strides = [1, 1]} : vector<128x16xf32> to vector<32x16xf32>
    %111 = vector.extract_strided_slice %108 {offsets = [64, 0], sizes = [32, 16], strides = [1, 1]} : vector<128x16xf32> to vector<32x16xf32>
    %112 = vector.extract_strided_slice %108 {offsets = [96, 0], sizes = [32, 16], strides = [1, 1]} : vector<128x16xf32> to vector<32x16xf32>
    %113 = tpu.concatenate %109, %110, %111, %112 in 1 : vector<32x16xf32>, vector<32x16xf32>, vector<32x16xf32>, vector<32x16xf32> -> vector<32x64xf32>
    %cst_25 = arith.constant dense<0.000000e+00> : vector<32x128xf32>
    %114 = tpu.matmul %113, %10, %cst_25 {dimension_numbers = #tpu.dot_dimension_numbers<[1], [0], [0], [1], [0, 0, 1, 1], [], []>, precision = #tpu.contract_precision<fp32>} : vector<32x64xf32>, vector<64x128xf32>, vector<32x128xf32> -> vector<32x128xf32>
    %115 = vector.extract_strided_slice %114 {offsets = [0, 0], sizes = [32, 16], strides = [1, 1]} : vector<32x128xf32> to vector<32x16xf32>
    %116 = vector.extract_strided_slice %9 {offsets = [5, 0], sizes = [1, 16], strides = [1, 1]} : vector<8x128xf32> to vector<1x16xf32>
    %117 = vector.broadcast %116 : vector<1x16xf32> to vector<32x16xf32>
    %118 = arith.addf %115, %117 : vector<32x16xf32>
    %cst_26 = arith.constant 0.000000e+00 : f32
    %119 = vector.broadcast %cst_26 : f32 to vector<32x16xf32>
    %120 = arith.maximumf %118, %119 : vector<32x16xf32>
    %121 = arith.addf %120, %7 : vector<32x16xf32>
    %cst_27 = arith.constant 0.000000e+00 : f32
    %122 = vector.broadcast %cst_27 : f32 to vector<32x16xf32>
    %123 = arith.maximumf %121, %122 : vector<32x16xf32>
    %124 = vector.extract_strided_slice %123 {offsets = [0, 0], sizes = [16, 16], strides = [1, 1]} : vector<32x16xf32> to vector<16x16xf32>
    %125 = tpu.transpose %124, [1, 0] : vector<16x16xf32> -> vector<16x16xf32>
    %c0_28 = arith.constant 0 : index
    %c0_29 = arith.constant 0 : index
    %c0_30 = arith.constant 0 : index
    %126 = vector.load %arg4[%c0_28, %c0_29, %c0_30] : memref<2x16x16xf32, #tpu.memory_space<vmem>>, vector<1x16x16xf32>
    %127 = vector.shape_cast %126 : vector<1x16x16xf32> to vector<16x16xf32>
    %128 = vector.shape_cast %125 : vector<16x16xf32> to vector<1x16x16xf32>
    tpu.vector_store %arg4[%c0_28, %c0_29, %c0_30], %128 {strides = array<i32>} : memref<2x16x16xf32, #tpu.memory_space<vmem>>, vector<1x16x16xf32>,
    %129 = vector.extract_strided_slice %123 {offsets = [16, 0], sizes = [16, 16], strides = [1, 1]} : vector<32x16xf32> to vector<16x16xf32>
    %130 = tpu.transpose %129, [1, 0] : vector<16x16xf32> -> vector<16x16xf32>
    %c1 = arith.constant 1 : index
    %c0_31 = arith.constant 0 : index
    %c0_32 = arith.constant 0 : index
    %131 = vector.load %arg4[%c1, %c0_31, %c0_32] : memref<2x16x16xf32, #tpu.memory_space<vmem>>, vector<1x16x16xf32>
    %132 = vector.shape_cast %131 : vector<1x16x16xf32> to vector<16x16xf32>
    %133 = vector.shape_cast %130 : vector<16x16xf32> to vector<1x16x16xf32>
    tpu.vector_store %arg4[%c1, %c0_31, %c0_32], %133 {strides = array<i32>} : memref<2x16x16xf32, #tpu.memory_space<vmem>>, vector<1x16x16xf32>,
    return
  }
  func.func @transform_0(%arg0: i32) -> (i32, i32, i32) {
    %c0_i32 = arith.constant 0 : i32
    %c0_i32_0 = arith.constant 0 : i32
    %c0_i32_1 = arith.constant 0 : i32
    %c0_i32_2 = arith.constant 0 : i32
    return %c0_i32, %c0_i32_0, %c0_i32_1 : i32, i32, i32
  }
  func.func @transform_1(%arg0: i32) -> (i32, i32) {
    %c0_i32 = arith.constant 0 : i32
    %c0_i32_0 = arith.constant 0 : i32
    %c0_i32_1 = arith.constant 0 : i32
    return %c0_i32, %c0_i32_0 : i32, i32
  }
  func.func @transform_2(%arg0: i32) -> (i32, i32) {
    %c0_i32 = arith.constant 0 : i32
    %c0_i32_0 = arith.constant 0 : i32
    %c0_i32_1 = arith.constant 0 : i32
    return %c0_i32, %c0_i32_0 : i32, i32
  }
  func.func @transform_3(%arg0: i32) -> (i32, i32, i32) {
    %c0_i32 = arith.constant 0 : i32
    %c0_i32_0 = arith.constant 0 : i32
    %c0_i32_1 = arith.constant 0 : i32
    %c0_i32_2 = arith.constant 0 : i32
    return %c0_i32, %c0_i32_0, %c0_i32_1 : i32, i32, i32
  }
}

</mosaic_0001>

<bundles_post_ra>
// kernel: _dynamic_interaction_impl.1
= control target key start
LH: loop header
LB: loop body
LE: loop exit
PB: predicated region body
PF: predicated region fallthrough
CT: control target
= control target key end

     0   :  { %s5103_s0 = inlined_call_operand.vmem [shape: f32[2,16,16], index: 0, kind: input, shape index: {}]   ;;  %s5104_s1 = inlined_call_operand.vmem [shape: f32[128,16], index: 1, kind: input, shape index: {}]   ;;  %s5105_s2 = inlined_call_operand.vmem [shape: f32[88,128], index: 2, kind: input, shape index: {}]   ;;  %s5106_s3 = inlined_call_operand.hbm [shape: f32[2,16,16], index: 3, kind: output, shape index: {}]  }
   0x1   :  { %v17_v0 = vld [vmem:[%s5103_s0 + $0x10] sm:$0xff]  ;;  %v15_v1 = vld [vmem:[%s5103_s0] sm:$0xff]  ;;  %v84_v3 = vld [vmem:[%s5105_s2 + $0x8] sm:$0xff] }
   0x2   :  { %51 = vxpose.xlu1.b32.start [1/2] (short) (narrow) %v17_v0, 16  ;;  %19 = vxpose.xlu0.b32.start [1/2] (short) (narrow) %v15_v1, 16  ;;  %v83_v2 = vld [vmem:[%s5105_s2] sm:$0xff]  ;;  %v18_v4 = vld [vmem:[%s5103_s0 + $0x18] sm:$0xff]  ;;  %v16_v5 = vld [vmem:[%s5103_s0 + $0x8] sm:$0xff]  ;;  %v115_v7 = vand.u32 4294901760, %v84_v3 }
   0x3   :  { %v112_v6 = vand.u32 4294901760, %v83_v2 }
   0x4   :  { %8 = vsyncpa [#allocation3], 0  ;;  %v227_v9 = vsub.f32 %v84_v3, %v115_v7  ;;  %vm98_vm0 = vcmask 130048   ;;  %v94_v48 = vlaneseq  ;;  %v85_v52 = vld [vmem:[%s5105_s2 + $0x10] sm:$0xff]  ;;  %s3769_s25 = smov 80   ;;  %s3770_s26 = smov 112  }
   0x5   :  { %v220_v8 = vsub.f32 %v83_v2, %v112_v6  ;;  %v3818_v10 = vpack.c.bf16 %v115_v7, %v112_v6  ;;  %s3771_s27 = smov 96   ;;  %v3867_v7 = vld [vmem:[%s5104_s1 + $0x8] sm:$0xff]  ;;  %vm1015_vm1 = vcmask 7168   ;;  %vm1049_vm2 = vcmask 23552   ;;  %s3776_s9 = smov 64  }
   0x6   :  { %52 = vxpose.xlu1.b32.end [2/2] (short) (narrow) %v18_v4, 16  ;;  %20 = vxpose.xlu0.b32.end [2/2] (short) (narrow) %v16_v5, 16  ;;  %v228_v12 = vand.u32 4294901760, %v227_v9  ;;  %v3842_v49 = vshrl.u32 %v94_v48, 7  ;;  %vm1032_vm3 = vcmask 15360   ;;  %vm1066_vm4 = vcmask 31744  }
   0x7   :  { %v221_v11 = vand.u32 4294901760, %v220_v8  ;;  %3472 = vmatprep.subr.bf16.mxu1 %v3818_v10  ;;  %v3479_v18 = vpack.c.bf16 %v227_v9, %v220_v8  ;;  %vm2377_vm5 = vcmask 261120   ;;  %vm2382_vm6 = vcmask 392192  }
   0x8   :  { %v229_v14 = vsub.f32 %v227_v9, %v228_v12  ;;  %3474 = vmatpush3.bf16.msra.mxu1 %v3818_v10  ;;  %v96_v50 = vsub.s32 0, %v3842_v49  ;;  %v3874_v9 = vld [vmem:[%s5104_s1 + $0x48] sm:$0xff]  ;;  %vm2387_vm7 = vcmask 523264  }
   0x9   :  { %v222_v13 = vsub.f32 %v220_v8, %v221_v11  ;;  %v3487_v19 = vpack.c.bf16 %v228_v12, %v221_v11 }
   0xa   :  { %v230_v16 = vand.u32 4294901760, %v229_v14  ;;  %v97_v54 = vrot.slane %v85_v52, %v96_v50  ;;  %v3985_v52 = vld [vmem:[%s5104_s1 + $0x78] sm:$0xff] }
   0xb   :  { %v223_v15 = vand.u32 4294901760, %v222_v13  ;;  %v3883_v13 = vld [vmem:[%s5104_s1 + $0x28] sm:$0xff] }
   0xd   :  { %v3475_v17 = vpack.c.bf16 %v230_v16, %v223_v15  ;;  %v3890_v15 = vld [vmem:[%s5104_s1 + $0x68] sm:$0xff] }
   0xf   :  { %3476 = vmatprep.subr.bf16.mxu0 %v3475_v17 }
  0x10   :  { %3478 = vmatpush3.bf16.msra.mxu0 %v3475_v17 }
  0x11   :  { %3480 = vmatprep.subr.bf16.mxu0 %v3479_v18 }
  0x82   :  { %v3822_v20 = vpop.trf.xlu1  ;;  %v3824_v21 = vpop.trf.xlu0 }
  0x83   :  { %v106_v22 = vsel %vm98_vm0, %v3822_v20, 0  ;;  %v100_v23 = vsel %vm98_vm0, %v3824_v21, 0 }
  0x84   :  { %v198_v24 = vand.u32 4294901760, %v106_v22  ;;  %v178_v25 = vand.u32 4294901760, %v100_v23 }
  0x86   :  { %v199_v26 = vsub.f32 %v106_v22, %v198_v24  ;;  %v179_v27 = vsub.f32 %v100_v23, %v178_v25  ;;  %v3830_v28 = vpop.trf.xlu1  ;;  %3293 = vmatprep.mubr.f32.mxu0 %v178_v25  ;;  %v3832_v29 = vpop.trf.xlu0  ;;  %v3906_v23 = vld [vmem:[%s5104_s1 + $0x60] sm:$0xff] }
  0x87   :  { %v109_v30 = vsel %vm98_vm0, %v3830_v28, 0  ;;  %v103_v31 = vsel %vm98_vm0, %v3832_v29, 0 }
  0x88   :  { %v208_v32 = vand.u32 4294901760, %v109_v30  ;;  %v188_v33 = vand.u32 4294901760, %v103_v31  ;;  %v180_v34 = vand.u32 4294901760, %v179_v27  ;;  %v200_v35 = vand.u32 4294901760, %v199_v26 }
  0x8a   :  { %v209_v36 = vsub.f32 %v109_v30, %v208_v32  ;;  %v189_v37 = vsub.f32 %v103_v31, %v188_v33  ;;  %3294 = vmatmul.mubr.f32.vlgmr.msra.gmra.mrb[0].mxu0 %v188_v33  ;;  %v181_v38 = vsub.f32 %v179_v27, %v180_v34  ;;  %v201_v42 = vsub.f32 %v199_v26, %v200_v35  ;;  %v3931_v31 = vld [vmem:[%s5104_s1 + $0x20] sm:$0xff] }
  0x8b   :  { %3482 = vmatpush3.bf16.msra.mxu0 %v3479_v18  ;;  %3296 = vmatprep.mubr.f32.mxu0 %v198_v24  ;;  %v3898_v18 = vld [vmem:[%s5104_s1] sm:$0xff] }
  0x8c   :  { %v182_v39 = vand.u32 4294901760, %v181_v38  ;;  %3484 = vmatprep.subr.bf16.mxu0 %v3818_v10  ;;  %v190_v40 = vand.u32 4294901760, %v189_v37  ;;  %v210_v41 = vand.u32 4294901760, %v209_v36  ;;  %v202_v46 = vand.u32 4294901760, %v201_v42  ;;  %v3962_v42 = vld [vmem:[%s5104_s1 + $0x10] sm:$0xff] }
  0x8e   :  { %3283 = vmatprep.mubr.f32.mxu1 %v182_v39  ;;  %3297 = vmatmul.mubr.f32.gmra.mrb[2].mxu0 %v208_v32  ;;  %v191_v43 = vsub.f32 %v189_v37, %v190_v40  ;;  %v211_v45 = vsub.f32 %v209_v36, %v210_v41  ;;  %v3954_v39 = vld [vmem:[%s5104_s1 + $0x58] sm:$0xff] }
  0x8f   :  { %3303 = vmatprep.mubr.f32.mxu0 %v179_v27 }
  0x90   :  { %v192_v44 = vand.u32 4294901760, %v191_v43  ;;  %v212_v47 = vand.u32 4294901760, %v211_v45  ;;  %v3970_v45 = vld [vmem:[%s5104_s1 + $0x50] sm:$0xff] }
  0x92   :  { %3284 = vmatmul.mubr.f32.vlgmr.msra.gmra.mrb[0].mxu1 %v192_v44  ;;  %3304 = vmatmul.mubr.f32.vlgmr.msra.gmra.mrb[0].mxu0 %v189_v37 }
  0x93   :  { %3486 = vmatpush3.bf16.msra.mxu0 %v3818_v10  ;;  %3286 = vmatprep.mubr.f32.mxu1 %v202_v46  ;;  %v3975_v46 = vld [vmem:[%s5104_s1 + $0x38] sm:$0xff] }
  0x94   :  { %3306 = vmatprep.mubr.f32.mxu0 %v199_v26  ;;  %3488 = vmatprep.subr.bf16.mxu0 %v3487_v19 }
  0x96   :  { %3287 = vmatmul.mubr.f32.gmra.mrb[2].mxu1 %v212_v47  ;;  %3307 = vmatmul.mubr.f32.gmra.mrb[2].mxu0 %v209_v36  ;;  %v3946_v36 = vld [vmem:[%s5104_s1 + $0x18] sm:$0xff] }
  0x97   :  { %3313 = vmatprep.mubr.f32.mxu0 %v180_v34 }
  0x9a   :  { %3314 = vmatmul.mubr.f32.vlgmr.msra.gmra.mrb[0].mxu0 %v190_v40 }
  0x9b   :  { %3490 = vmatpush3.bf16.msra.mxu0 %v3487_v19  ;;  %3316 = vmatprep.mubr.f32.mxu0 %v200_v35 }
  0x9c   :  { %3492 = vmatprep.subr.bf16.mxu0 %v3818_v10 }
  0x9e   :  { %3317 = vmatmul.mubr.f32.gmra.mrb[2].mxu0 %v210_v41 }
  0x9f   :  { %3323 = vmatprep.mubr.f32.mxu0 %v178_v25 }
  0xa2   :  { %3324 = vmatmul.mubr.f32.vlgmr.msra.gmra.mrb[0].mxu0 %v188_v33 }
  0xa3   :  { %3494 = vmatpush3.bf16.msra.mxu0 %v3818_v10  ;;  %3326 = vmatprep.mubr.f32.mxu0 %v198_v24 }
  0xa6   :  { %3327 = vmatmul.mubr.f32.gmra.mrb[2].mxu0 %v208_v32 }
  0xa7   :  { %3333 = vmatprep.mubr.f32.mxu0 %v178_v25 }
  0xaa   :  { %3334 = vmatmul.mubr.f32.vlgmr.msra.gmra.mrb[0].mxu0 %v188_v33  ;;  %v3938_v33 = vld [vmem:[%s5104_s1 + $0x40] sm:$0xff] }
  0xab   :  { %3336 = vmatprep.mubr.f32.mxu0 %v198_v24 }
  0xae   :  { %3337 = vmatmul.mubr.f32.gmra.mrb[2].mxu0 %v208_v32 }
 0x165   :  { %v3285_v51 = vpop.f32.mrb[0].mxu1 }
 0x166   :  { %v184_v53 = vpop.f32.mrb[1].mxu1  ;;  %v195_v58 = vadd.f32 %v3285_v51, %v97_v54 }
 0x167   :  { %v185_v59 = vadd.f32 %v184_v53, %v97_v54 }
 0x169   :  { %v3288_v55 = vpop.f32.mrb[2].mxu1 }
 0x16a   :  { %v204_v56 = vpop.f32.mrb[3].mxu1  ;;  %v215_v0 = vadd.f32 %v3288_v55, %v97_v54 }
 0x16b   :  { %v205_v57 = vadd.f32 %v204_v56, %v97_v54 }
 0x17d   :  { %v3335_v60 = vpop.f32.mrb[0].mxu0 }
 0x17e   :  { %v3592_v61 = vadd.f32 %v3335_v60, %v195_v58  ;;  %v677_v62 = vpop.f32.mrb[1].mxu0 }
 0x17f   :  { %v3594_v63 = vadd.f32 %v677_v62, %v185_v59 }
 0x180   :  { %v3848_v1 = vmax.f32 %v3592_v61, 0.0 }
 0x181   :  { %v3338_v2 = vpop.f32.mrb[2].mxu0  ;;  %v3854_v6 = vmax.f32 %v3594_v63, 0.0  ;;  %v4005_v63 = vld [vmem:[%s5104_s1 + $0x70] sm:$0xff] }
 0x182   :  { %v3596_v3 = vadd.f32 %v3338_v2, %v215_v0  ;;  %v689_v4 = vpop.f32.mrb[3].mxu0  ;;  %941 = vrot.lane.b32.xlu0 %v3848_v1, %s3769_s25  ;;  %789 = vrot.lane.b32.xlu1 %v3848_v1, %s3770_s26  ;;  %v720_v8 = vmul.f32 %v3867_v7, %v3848_v1  ;;  %v728_v11 = vmul.f32 %v3874_v9, %v3848_v1 }
 0x183   :  { %v3598_v5 = vadd.f32 %v689_v4, %v205_v57  ;;  %v724_v14 = vmul.f32 %v3883_v13, %v3848_v1  ;;  %v732_v17 = vmul.f32 %v3890_v15, %v3848_v1  ;;  %v719_v22 = vmul.f32 %v3898_v18, %v3854_v6  ;;  %v3995_v57 = vld [vmem:[%s5104_s1 + $0x30] sm:$0xff] }
 0x184   :  { %v738_v10 = vsel %vm98_vm0, %v720_v8, 0.0  ;;  %v762_v12 = vsel %vm98_vm0, %v728_v11, 0.0  ;;  %v731_v25 = vmul.f32 %v3906_v23, %v3854_v6  ;;  %v3911_v26 = vmax.f32 %v3596_v3, 0.0 }
 0x185   :  { %v750_v16 = vsel %vm98_vm0, %v724_v14, 0.0  ;;  %v774_v19 = vsel %vm98_vm0, %v732_v17, 0.0  ;;  %v735_v24 = vsel %vm98_vm0, %v719_v22, 0.0  ;;  %v3920_v30 = vmax.f32 %v3598_v5, 0.0 }
 0x186   :  { %865 = vrot.lane.b32.xlu1 %v3848_v1, %s3771_s27  ;;  %787 = vrot.lane.b32.xlu0 %v3854_v6, %s3770_s26  ;;  %v771_v27 = vsel %vm98_vm0, %v731_v25, 0.0  ;;  %v723_v32 = vmul.f32 %v3931_v31, %v3854_v6  ;;  %v727_v35 = vmul.f32 %v3938_v33, %v3854_v6  ;;  %v722_v38 = vmul.f32 %v3946_v36, %v3911_v26 }
 0x187   :  { %v730_v41 = vmul.f32 %v3954_v39, %v3911_v26  ;;  %v721_v44 = vmul.f32 %v3962_v42, %v3920_v30  ;;  %v729_v48 = vmul.f32 %v3970_v45, %v3920_v30  ;;  %v726_v51 = vmul.f32 %v3975_v46, %v3911_v26 }
 0x188   :  { %v747_v34 = vsel %vm98_vm0, %v723_v32, 0.0  ;;  %v759_v37 = vsel %vm98_vm0, %v727_v35, 0.0  ;;  %v744_v40 = vsel %vm98_vm0, %v722_v38, 0.0  ;;  %v734_v56 = vmul.f32 %v3985_v52, %v3911_v26 }
 0x189   :  { %v768_v43 = vsel %vm98_vm0, %v730_v41, 0.0  ;;  %v741_v47 = vsel %vm98_vm0, %v721_v44, 0.0  ;;  %v765_v53 = vsel %vm98_vm0, %v729_v48, 0.0  ;;  %v756_v55 = vsel %vm98_vm0, %v726_v51, 0.0 }
 0x18a   :  { %863 = vrot.lane.b32.xlu1 %v3854_v6, %s3771_s27  ;;  %v780_v61 = vsel %vm98_vm0, %v734_v56, 0.0  ;;  %v725_v62 = vmul.f32 %v3995_v57, %v3920_v30  ;;  %v733_v4 = vmul.f32 %v4005_v63, %v3920_v30 }
 0x18c   :  { %v753_v3 = vsel %vm98_vm0, %v725_v62, 0.0  ;;  %v777_v11 = vsel %vm98_vm0, %v733_v4, 0.0 }
 0x18e   :  { %939 = vrot.lane.b32.xlu1 %v3854_v6, %s3769_s25 }
 0x1a5   :  { %739 = vadd.xlane.f32.xlu0 %v738_v10 }
 0x1a9   :  { %763 = vadd.xlane.f32.xlu0 %v762_v12 }
 0x1b2   :  { %751 = vadd.xlane.f32.xlu1 %v750_v16 }
 0x1b6   :  { %775 = vadd.xlane.f32.xlu1 %v774_v19 }
 0x1ba   :  { %736 = vadd.xlane.f32.xlu1 %v735_v24 }
 0x1be   :  { %772 = vadd.xlane.f32.xlu1 %v771_v27 }
 0x1bf   :  { %793 = vrot.lane.b32.xlu0 %v3911_v26, %s3770_s26 }
 0x1c3   :  { %869 = vrot.lane.b32.xlu0 %v3911_v26, %s3771_s27 }
 0x1c7   :  { %945 = vrot.lane.b32.xlu0 %v3911_v26, %s3769_s25 }
 0x1cf   :  { %791 = vrot.lane.b32.xlu1 %v3920_v30, %s3770_s26 }
 0x1d3   :  { %867 = vrot.lane.b32.xlu1 %v3920_v30, %s3771_s27 }
 0x1d7   :  { %943 = vrot.lane.b32.xlu1 %v3920_v30, %s3769_s25 }
 0x1e6   :  { %748 = vadd.xlane.f32.xlu0 %v747_v34 }
 0x1ea   :  { %760 = vadd.xlane.f32.xlu0 %v759_v37 }
 0x1ee   :  { %745 = vadd.xlane.f32.xlu0 %v744_v40 }
 0x1f2   :  { %769 = vadd.xlane.f32.xlu0 %v768_v43 }
 0x1f4   :  { %v790_v50 = vpop.permute.xlu1 %789  ;;  %v942_v10 = vpop.permute.xlu0 %941 }
 0x1f5   :  { %v804_v54 = vmul.f32 %v790_v50, %v3883_v13  ;;  %v808_v59 = vmul.f32 %v790_v50, %v3874_v9  ;;  %v812_v8 = vmul.f32 %v790_v50, %v3890_v15  ;;  %v800_v12 = vmul.f32 %v790_v50, %v3867_v7 }
 0x1f6   :  { %742 = vadd.xlane.f32.xlu0 %v741_v47  ;;  %v956_v16 = vmul.f32 %v942_v10, %v3883_v13  ;;  %v952_v38 = vmul.f32 %v942_v10, %v3867_v7  ;;  %v960_v44 = vmul.f32 %v942_v10, %v3874_v9 }
 0x1f7   :  { %v830_v58 = vsel %vm98_vm0, %v804_v54, 0.0  ;;  %v842_v0 = vsel %vm98_vm0, %v808_v59, 0.0  ;;  %v854_v14 = vsel %vm98_vm0, %v812_v8, 0.0  ;;  %v818_v17 = vsel %vm98_vm0, %v800_v12, 0.0 }
 0x1f8   :  { %v866_v60 = vpop.permute.xlu1 %865  ;;  %v982_v22 = vsel %vm98_vm0, %v956_v16, 0.0  ;;  %v788_v25 = vpop.permute.xlu0 %787  ;;  %v970_v43 = vsel %vm98_vm0, %v952_v38, 0.0  ;;  %v994_v51 = vsel %vm98_vm0, %v960_v44, 0.0 }
 0x1f9   :  { %v876_v2 = vmul.f32 %v866_v60, %v3867_v7  ;;  %v880_v19 = vmul.f32 %v866_v60, %v3883_v13  ;;  %v888_v24 = vmul.f32 %v866_v60, %v3890_v15  ;;  %v884_v32 = vmul.f32 %v866_v60, %v3874_v9 }
 0x1fa   :  { %766 = vadd.xlane.f32.xlu0 %v765_v53  ;;  %v799_v35 = vmul.f32 %v788_v25, %v3898_v18  ;;  %v964_v7 = vmul.f32 %v942_v10, %v3890_v15  ;;  %v803_v9 = vmul.f32 %v788_v25, %v3931_v31  ;;  %v807_v15 = vmul.f32 %v788_v25, %v3938_v33 }
 0x1fb   :  { %757 = vadd.xlane.f32.xlu1 %v756_v55  ;;  %v894_v5 = vsel %vm98_vm0, %v876_v2, 0.0  ;;  %v906_v27 = vsel %vm98_vm0, %v880_v19, 0.0  ;;  %v930_v34 = vsel %vm98_vm0, %v888_v24, 0.0  ;;  %v918_v13 = vsel %vm98_vm0, %v884_v32, 0.0 }
 0x1fc   :  { %v864_v37 = vpop.permute.xlu1 %863  ;;  %v815_v40 = vsel %vm98_vm0, %v799_v35, 0.0  ;;  %v1006_v55 = vsel %vm98_vm0, %v964_v7, 0.0  ;;  %v827_v59 = vsel %vm98_vm0, %v803_v9, 0.0  ;;  %v839_v62 = vsel %vm98_vm0, %v807_v15, 0.0 }
 0x1fd   :  { %v875_v41 = vmul.f32 %v864_v37, %v3898_v18  ;;  %v883_v48 = vmul.f32 %v864_v37, %v3938_v33  ;;  %v811_v4 = vmul.f32 %v788_v25, %v3906_v23 }
 0x1fe   :  { %831 = vadd.xlane.f32.xlu0 %v830_v58  ;;  %v887_v58 = vmul.f32 %v864_v37, %v3906_v23 }
 0x1ff   :  { %781 = vadd.xlane.f32.xlu1 %v780_v61  ;;  %v891_v47 = vsel %vm98_vm0, %v875_v41, 0.0  ;;  %v915_v53 = vsel %vm98_vm0, %v883_v48, 0.0 }
 0x200   :  { %v940_v50 = vpop.permute.xlu1 %939  ;;  %v927_v60 = vsel %vm98_vm0, %v887_v58, 0.0 }
 0x201   :  { %v955_v54 = vmul.f32 %v940_v50, %v3931_v31  ;;  %v963_v61 = vmul.f32 %v940_v50, %v3906_v23  ;;  %v951_v8 = vmul.f32 %v940_v50, %v3898_v18 }
 0x202   :  { %843 = vadd.xlane.f32.xlu0 %v842_v0  ;;  %v879_v0 = vmul.f32 %v864_v37, %v3931_v31  ;;  %v959_v31 = vmul.f32 %v940_v50, %v3938_v33 }
 0x203   :  { %754 = vadd.xlane.f32.xlu1 %v753_v3  ;;  %v979_v56 = vsel %vm98_vm0, %v955_v54, 0.0  ;;  %v1003_v2 = vsel %vm98_vm0, %v963_v61, 0.0 }
 0x204   :  { %v903_v3 = vsel %vm98_vm0, %v879_v0, 0.0 }
 0x206   :  { %895 = vadd.xlane.f32.xlu0 %v894_v5  ;;  %v851_v5 = vsel %vm98_vm0, %v811_v4, 0.0 }
 0x207   :  { %778 = vadd.xlane.f32.xlu1 %v777_v11  ;;  %v967_v11 = vsel %vm98_vm0, %v951_v8, 0.0 }
 0x20a   :  { %855 = vadd.xlane.f32.xlu0 %v854_v14  ;;  %v991_v14 = vsel %vm98_vm0, %v959_v31, 0.0 }
 0x20b   :  { %819 = vadd.xlane.f32.xlu1 %v818_v17 }
 0x20e   :  { %983 = vadd.xlane.f32.xlu0 %v982_v22 }
 0x20f   :  { %907 = vadd.xlane.f32.xlu1 %v906_v27 }
 0x212   :  { %931 = vadd.xlane.f32.xlu0 %v930_v34 }
 0x213   :  { %919 = vadd.xlane.f32.xlu1 %v918_v13 }
 0x216   :  { %816 = vadd.xlane.f32.xlu0 %v815_v40 }
 0x217   :  { %971 = vadd.xlane.f32.xlu1 %v970_v43 }
 0x21a   :  { %892 = vadd.xlane.f32.xlu0 %v891_v47 }
 0x21b   :  { %995 = vadd.xlane.f32.xlu1 %v994_v51 }
 0x21e   :  { %916 = vadd.xlane.f32.xlu0 %v915_v53 }
 0x21f   :  { %1007 = vadd.xlane.f32.xlu1 %v1006_v55 }
 0x222   :  { %980 = vadd.xlane.f32.xlu0 %v979_v56 }
 0x223   :  { %828 = vadd.xlane.f32.xlu1 %v827_v59 }
 0x226   :  { %928 = vadd.xlane.f32.xlu0 %v927_v60 }
 0x227   :  { %840 = vadd.xlane.f32.xlu1 %v839_v62 }
 0x22a   :  { %1004 = vadd.xlane.f32.xlu0 %v1003_v2 }
 0x22b   :  { %904 = vadd.xlane.f32.xlu1 %v903_v3 }
 0x22f   :  { %852 = vadd.xlane.f32.xlu1 %v851_v5 }
 0x232   :  { %v4053_v10 = vpop.xlane.xlu0 %739 }
 0x233   :  { %968 = vadd.xlane.f32.xlu1 %v967_v11 }
 0x236   :  { %v4057_v12 = vpop.xlane.xlu0 %763 }
 0x237   :  { %992 = vadd.xlane.f32.xlu1 %v991_v14 }
 0x23a   :  { %v794_v16 = vpop.permute.xlu0 %793 }
 0x23b   :  { %v806_v23 = vmul.f32 %v794_v16, %v3975_v46  ;;  %v802_v17 = vmul.f32 %v794_v16, %v3946_v36  ;;  %v810_v22 = vmul.f32 %v794_v16, %v3954_v39  ;;  %v814_v41 = vmul.f32 %v794_v16, %v3985_v52 }
 0x23d   :  { %v836_v18 = vsel %vm98_vm0, %v806_v23, 0.0  ;;  %v824_v19 = vsel %vm98_vm0, %v802_v17, 0.0  ;;  %v848_v27 = vsel %vm98_vm0, %v810_v22, 0.0  ;;  %v860_v47 = vsel %vm98_vm0, %v814_v41, 0.0 }
 0x23e   :  { %v870_v24 = vpop.permute.xlu0 %869  ;;  %837 = vadd.xlane.f32.xlu0 %v836_v18  ;;  %825 = vadd.xlane.f32.xlu1 %v824_v19 }
 0x23f   :  { %v4065_v33 = vpop.xlane.xlu1 %751  ;;  %v882_v25 = vmul.f32 %v870_v24, %v3975_v46  ;;  %v878_v34 = vmul.f32 %v870_v24, %v3946_v36  ;;  %v886_v35 = vmul.f32 %v870_v24, %v3954_v39  ;;  %v890_v54 = vmul.f32 %v870_v24, %v3985_v52 }
 0x241   :  { %v912_v32 = vsel %vm98_vm0, %v882_v25, 0.0  ;;  %v900_v38 = vsel %vm98_vm0, %v878_v34, 0.0  ;;  %v924_v40 = vsel %vm98_vm0, %v886_v35, 0.0  ;;  %v936_v56 = vsel %vm98_vm0, %v890_v54, 0.0 }
 0x242   :  { %v946_v37 = vpop.permute.xlu0 %945  ;;  %849 = vadd.xlane.f32.xlu0 %v848_v27  ;;  %913 = vadd.xlane.f32.xlu1 %v912_v32 }
 0x243   :  { %v4072_v13 = vpop.xlane.xlu1 %775  ;;  %v954_v43 = vmul.f32 %v946_v37, %v3946_v36  ;;  %v958_v50 = vmul.f32 %v946_v37, %v3975_v46  ;;  %v962_v51 = vmul.f32 %v946_v37, %v3954_v39  ;;  %v966_v55 = vmul.f32 %v946_v37, %v3985_v52 }
 0x245   :  { %v976_v48 = vsel %vm98_vm0, %v954_v43, 0.0  ;;  %v988_v53 = vsel %vm98_vm0, %v958_v50, 0.0  ;;  %v1000_v36 = vsel %vm98_vm0, %v962_v51, 0.0  ;;  %v1012_v46 = vsel %vm98_vm0, %v966_v55, 0.0 }
 0x246   :  { %901 = vadd.xlane.f32.xlu0 %v900_v38  ;;  %925 = vadd.xlane.f32.xlu1 %v924_v40 }
 0x247   :  { %v4078_v44 = vpop.xlane.xlu1 %736 }
 0x24a   :  { %861 = vadd.xlane.f32.xlu0 %v860_v47  ;;  %977 = vadd.xlane.f32.xlu1 %v976_v48 }
 0x24b   :  { %v4084_v7 = vpop.xlane.xlu1 %772 }
 0x24e   :  { %989 = vadd.xlane.f32.xlu0 %v988_v53  ;;  %1001 = vadd.xlane.f32.xlu1 %v1000_v36 }
 0x24f   :  { %v792_v9 = vpop.permute.xlu1 %791 }
 0x250   :  { %v805_v39 = vmul.f32 %v792_v9, %v3995_v57  ;;  %v801_v58 = vmul.f32 %v792_v9, %v3962_v42  ;;  %v809_v52 = vmul.f32 %v792_v9, %v3970_v45  ;;  %v813_v11 = vmul.f32 %v792_v9, %v4005_v63 }
 0x252   :  { %937 = vadd.xlane.f32.xlu0 %v936_v56  ;;  %1013 = vadd.xlane.f32.xlu1 %v1012_v46  ;;  %v833_v15 = vsel %vm98_vm0, %v805_v39, 0.0  ;;  %v821_v60 = vsel %vm98_vm0, %v801_v58, 0.0  ;;  %v845_v62 = vsel %vm98_vm0, %v809_v52, 0.0  ;;  %v857_v14 = vsel %vm98_vm0, %v813_v11, 0.0 }
 0x253   :  { %v868_v59 = vpop.permute.xlu1 %867 }
 0x254   :  { %v877_v61 = vmul.f32 %v868_v59, %v3962_v42  ;;  %v881_v2 = vmul.f32 %v868_v59, %v3995_v57  ;;  %v885_v3 = vmul.f32 %v868_v59, %v3970_v45  ;;  %v889_v23 = vmul.f32 %v868_v59, %v4005_v63 }
 0x256   :  { %834 = vadd.xlane.f32.xlu1 %v833_v15  ;;  %822 = vadd.xlane.f32.xlu0 %v821_v60  ;;  %v897_v0 = vsel %vm98_vm0, %v877_v61, 0.0  ;;  %v909_v5 = vsel %vm98_vm0, %v881_v2, 0.0  ;;  %v921_v8 = vsel %vm98_vm0, %v885_v3, 0.0  ;;  %v933_v18 = vsel %vm98_vm0, %v889_v23, 0.0 }
 0x257   :  { %v944_v4 = vpop.permute.xlu1 %943 }
 0x258   :  { %v957_v31 = vmul.f32 %v944_v4, %v3995_v57  ;;  %v953_v17 = vmul.f32 %v944_v4, %v3962_v42  ;;  %v965_v22 = vmul.f32 %v944_v4, %v4005_v63  ;;  %v961_v57 = vmul.f32 %v944_v4, %v3970_v45 }
 0x25a   :  { %846 = vadd.xlane.f32.xlu1 %v845_v62  ;;  %898 = vadd.xlane.f32.xlu0 %v897_v0  ;;  %v985_v16 = vsel %vm98_vm0, %v957_v31, 0.0  ;;  %v973_v19 = vsel %vm98_vm0, %v953_v17, 0.0  ;;  %v1009_v24 = vsel %vm98_vm0, %v965_v22, 0.0  ;;  %v997_v25 = vsel %vm98_vm0, %v961_v57, 0.0 }
 0x25e   :  { %910 = vadd.xlane.f32.xlu1 %v909_v5  ;;  %922 = vadd.xlane.f32.xlu0 %v921_v8 }
 0x262   :  { %858 = vadd.xlane.f32.xlu1 %v857_v14  ;;  %986 = vadd.xlane.f32.xlu0 %v985_v16 }
 0x266   :  { %934 = vadd.xlane.f32.xlu0 %v933_v18  ;;  %974 = vadd.xlane.f32.xlu1 %v973_v19 }
 0x26a   :  { %1010 = vadd.xlane.f32.xlu0 %v1009_v24  ;;  %998 = vadd.xlane.f32.xlu1 %v997_v25 }
 0x273   :  { %v749_v27 = vpop.xlane.xlu0 %748 }
 0x277   :  { %v4116_v42 = vpop.xlane.xlu0 %760 }
 0x27b   :  { %v4118_v32 = vpop.xlane.xlu0 %745 }
 0x27f   :  { %v4120_v34 = vpop.xlane.xlu0 %769 }
 0x283   :  { %v4122_v35 = vpop.xlane.xlu0 %742 }
 0x287   :  { %v4124_v63 = vpop.xlane.xlu0 %766 }
 0x288   :  { %v4126_v45 = vpop.xlane.xlu1 %757 }
 0x28b   :  { %v832_v37 = vpop.xlane.xlu0 %831 }
 0x28c   :  { %v4128_v38 = vpop.xlane.xlu1 %781  ;;  %v1021_v53 = vsel %vm1015_vm1, %v4065_v33, %v832_v37 }
 0x28f   :  { %v844_v40 = vpop.xlane.xlu0 %843 }
 0x290   :  { %v4130_v41 = vpop.xlane.xlu1 %754  ;;  %v1025_v60 = vsel %vm1015_vm1, %v4057_v12, %v844_v40 }
 0x293   :  { %v896_v43 = vpop.xlane.xlu0 %895 }
 0x294   :  { %v4132_v47 = vpop.xlane.xlu1 %778 }
 0x297   :  { %v856_v48 = vpop.xlane.xlu0 %855 }
 0x298   :  { %v820_v50 = vpop.xlane.xlu1 %819  ;;  %v1029_v2 = vsel %vm1015_vm1, %v4072_v13, %v856_v48 }
 0x299   :  { %v1017_v46 = vsel %vm1015_vm1, %v4053_v10, %v820_v50 }
 0x29a   :  { %v1034_v33 = vsel %vm1032_vm3, %v1017_v46, %v896_v43 }
 0x29b   :  { %v984_v51 = vpop.xlane.xlu0 %983 }
 0x29c   :  { %v908_v36 = vpop.xlane.xlu1 %907 }
 0x29d   :  { %v1038_v54 = vsel %vm1032_vm3, %v1021_v53, %v908_v36 }
 0x29e   :  { %v4138_v55 = vsel %vm1049_vm2, %v1038_v54, %v984_v51 }
 0x29f   :  { %v1082_v9 = vsel %vm1066_vm4, %v4138_v55, 0.0  ;;  %v932_v39 = vpop.xlane.xlu0 %931 }
 0x2a0   :  { %1083 = vadd.xlane.f32.xlu1 %v1082_v9  ;;  %v920_v56 = vpop.xlane.xlu1 %919  ;;  %v1046_v3 = vsel %vm1032_vm3, %v1029_v2, %v932_v39 }
 0x2a1   :  { %v1042_v61 = vsel %vm1032_vm3, %v1025_v60, %v920_v56 }
 0x2a3   :  { %v817_v52 = vpop.xlane.xlu0 %816 }
 0x2a4   :  { %v972_v58 = vpop.xlane.xlu1 %971  ;;  %v1016_v57 = vsel %vm1015_vm1, %v4078_v44, %v817_v52 }
 0x2a5   :  { %v4146_v59 = vsel %vm1049_vm2, %v1034_v33, %v972_v58 }
 0x2a6   :  { %v1070_v15 = vsel %vm1066_vm4, %v4146_v59, 0.0 }
 0x2a7   :  { %1071 = vadd.xlane.f32.xlu0 %v1070_v15  ;;  %v893_v5 = vpop.xlane.xlu0 %892 }
 0x2a8   :  { %v996_v62 = vpop.xlane.xlu1 %995  ;;  %v1033_v24 = vsel %vm1032_vm3, %v1016_v57, %v893_v5 }
 0x2a9   :  { %v4154_v10 = vsel %vm1049_vm2, %v1042_v61, %v996_v62 }
 0x2aa   :  { %v1094_v0 = vsel %vm1066_vm4, %v4154_v10, 0.0 }
 0x2ab   :  { %1095 = vadd.xlane.f32.xlu1 %v1094_v0  ;;  %v917_v31 = vpop.xlane.xlu0 %916 }
 0x2ac   :  { %v1008_v4 = vpop.xlane.xlu1 %1007 }
 0x2ad   :  { %v4162_v12 = vsel %vm1049_vm2, %v1046_v3, %v1008_v4 }
 0x2ae   :  { %v1106_v8 = vsel %vm1066_vm4, %v4162_v12, 0.0 }
 0x2af   :  { %1107 = vadd.xlane.f32.xlu1 %v1106_v8  ;;  %v981_v17 = vpop.xlane.xlu0 %980 }
 0x2b0   :  { %v829_v11 = vpop.xlane.xlu1 %828 }
 0x2b1   :  { %v1020_v16 = vsel %vm1015_vm1, %v749_v27, %v829_v11 }
 0x2b3   :  { %v929_v25 = vpop.xlane.xlu0 %928 }
 0x2b4   :  { %v841_v14 = vpop.xlane.xlu1 %840 }
 0x2b5   :  { %v1024_v27 = vsel %vm1015_vm1, %v4116_v42, %v841_v14 }
 0x2b6   :  { %v1041_v44 = vsel %vm1032_vm3, %v1024_v27, %v917_v31 }
 0x2b7   :  { %v1005_v36 = vpop.xlane.xlu0 %1004 }
 0x2b8   :  { %v905_v23 = vpop.xlane.xlu1 %904 }
 0x2b9   :  { %v1037_v13 = vsel %vm1032_vm3, %v1020_v16, %v905_v23 }
 0x2ba   :  { %v4169_v18 = vsel %vm1049_vm2, %v1037_v13, %v981_v17 }
 0x2bb   :  { %v1079_v19 = vsel %vm1066_vm4, %v4169_v18, 0.0 }
 0x2bc   :  { %1080 = vadd.xlane.f32.xlu1 %v1079_v19  ;;  %v853_v22 = vpop.xlane.xlu1 %852 }
 0x2bd   :  { %v1028_v40 = vsel %vm1015_vm1, %v4084_v7, %v853_v22 }
 0x2be   :  { %v1045_v51 = vsel %vm1032_vm3, %v1028_v40, %v929_v25 }
 0x2bf   :  { %v4193_v7 = vsel %vm1049_vm2, %v1045_v51, %v1005_v36 }
 0x2c0   :  { %v969_v37 = vpop.xlane.xlu1 %968  ;;  %v1103_v54 = vsel %vm1066_vm4, %v4193_v7, 0.0 }
 0x2c1   :  { %v4181_v43 = vsel %vm1049_vm2, %v1033_v24, %v969_v37 }
 0x2c2   :  { %v1067_v48 = vsel %vm1066_vm4, %v4181_v43, 0.0 }
 0x2c3   :  { %1068 = vadd.xlane.f32.xlu0 %v1067_v48 }
 0x2c4   :  { %v993_v50 = vpop.xlane.xlu1 %992 }
 0x2c5   :  { %v4188_v53 = vsel %vm1049_vm2, %v1041_v44, %v993_v50 }
 0x2c6   :  { %v1091_v42 = vsel %vm1066_vm4, %v4188_v53, 0.0 }
 0x2c7   :  { %1092 = vadd.xlane.f32.xlu0 %v1091_v42 }
 0x2cb   :  { %v838_v9 = vpop.xlane.xlu0 %837  ;;  %1104 = vadd.xlane.f32.xlu0 %v1103_v54  ;;  %v826_v56 = vpop.xlane.xlu1 %825 }
 0x2cc   :  { %v1019_v15 = vsel %vm1015_vm1, %v4118_v32, %v826_v56  ;;  %v1023_v2 = vsel %vm1015_vm1, %v4126_v45, %v838_v9 }
 0x2cf   :  { %v850_v46 = vpop.xlane.xlu0 %849  ;;  %v914_v39 = vpop.xlane.xlu1 %913 }
 0x2d0   :  { %v1040_v3 = vsel %vm1032_vm3, %v1023_v2, %v914_v39  ;;  %v1027_v32 = vsel %vm1015_vm1, %v4120_v34, %v850_v46 }
 0x2d3   :  { %v902_v58 = vpop.xlane.xlu0 %901  ;;  %v926_v33 = vpop.xlane.xlu1 %925 }
 0x2d4   :  { %v1036_v60 = vsel %vm1032_vm3, %v1019_v15, %v902_v58  ;;  %v1044_v11 = vsel %vm1032_vm3, %v1027_v32, %v926_v33 }
 0x2d7   :  { %v862_v52 = vpop.xlane.xlu0 %861  ;;  %v978_v61 = vpop.xlane.xlu1 %977 }
 0x2d8   :  { %v4201_v62 = vsel %vm1049_vm2, %v1036_v60, %v978_v61  ;;  %v1031_v45 = vsel %vm1015_vm1, %v4128_v38, %v862_v52 }
 0x2d9   :  { %v1076_v0 = vsel %vm1066_vm4, %v4201_v62, 0.0 }
 0x2da   :  { %1077 = vadd.xlane.f32.xlu0 %v1076_v0 }
 0x2db   :  { %v990_v4 = vpop.xlane.xlu0 %989  ;;  %v1002_v5 = vpop.xlane.xlu1 %1001 }
 0x2dc   :  { %v4211_v8 = vsel %vm1049_vm2, %v1040_v3, %v990_v4  ;;  %v4217_v14 = vsel %vm1049_vm2, %v1044_v11, %v1002_v5 }
 0x2dd   :  { %v1088_v31 = vsel %vm1066_vm4, %v4211_v8, 0.0  ;;  %v1100_v34 = vsel %vm1066_vm4, %v4217_v14, 0.0 }
 0x2de   :  { %1089 = vadd.xlane.f32.xlu1 %v1088_v31 }
 0x2df   :  { %v938_v16 = vpop.xlane.xlu0 %937  ;;  %v1014_v23 = vpop.xlane.xlu1 %1013 }
 0x2e0   :  { %v1048_v17 = vsel %vm1032_vm3, %v1031_v45, %v938_v16 }
 0x2e1   :  { %v4225_v13 = vsel %vm1049_vm2, %v1048_v17, %v1014_v23 }
 0x2e2   :  { %1101 = vadd.xlane.f32.xlu1 %v1100_v34  ;;  %v1112_v57 = vsel %vm1066_vm4, %v4225_v13, 0.0 }
 0x2e3   :  { %v823_v19 = vpop.xlane.xlu0 %822  ;;  %v835_v22 = vpop.xlane.xlu1 %834 }
 0x2e4   :  { %v1022_v27 = vsel %vm1015_vm1, %v4130_v41, %v835_v22  ;;  %v1018_v36 = vsel %vm1015_vm1, %v4122_v35, %v823_v19 }
 0x2e6   :  { %1113 = vadd.xlane.f32.xlu1 %v1112_v57 }
 0x2e7   :  { %v899_v24 = vpop.xlane.xlu0 %898  ;;  %v847_v25 = vpop.xlane.xlu1 %846 }
 0x2e8   :  { %v1035_v42 = vsel %vm1032_vm3, %v1018_v36, %v899_v24  ;;  %v1026_v46 = vsel %vm1015_vm1, %v4124_v63, %v847_v25 }
 0x2eb   :  { %v923_v38 = vpop.xlane.xlu0 %922  ;;  %v911_v37 = vpop.xlane.xlu1 %910 }
 0x2ec   :  { %v1039_v40 = vsel %vm1032_vm3, %v1022_v27, %v911_v37  ;;  %v1043_v39 = vsel %vm1032_vm3, %v1026_v46, %v923_v38 }
 0x2ef   :  { %v987_v48 = vpop.xlane.xlu0 %986  ;;  %v859_v50 = vpop.xlane.xlu1 %858 }
 0x2f0   :  { %v4233_v44 = vsel %vm1049_vm2, %v1039_v40, %v987_v48  ;;  %v1030_v35 = vsel %vm1015_vm1, %v4132_v47, %v859_v50 }
 0x2f1   :  { %v1085_v51 = vsel %vm1066_vm4, %v4233_v44, 0.0 }
 0x2f2   :  { %1086 = vadd.xlane.f32.xlu1 %v1085_v51 }
 0x2f3   :  { %v935_v54 = vpop.xlane.xlu0 %934  ;;  %v975_v9 = vpop.xlane.xlu1 %974 }
 0x2f4   :  { %v4241_v41 = vsel %vm1049_vm2, %v1035_v42, %v975_v9  ;;  %v1047_v60 = vsel %vm1032_vm3, %v1030_v35, %v935_v54 }
 0x2f5   :  { %v1073_v56 = vsel %vm1066_vm4, %v4241_v41, 0.0 }
 0x2f6   :  { %1074 = vadd.xlane.f32.xlu0 %v1073_v56 }
 0x2f7   :  { %v1011_v58 = vpop.xlane.xlu0 %1010  ;;  %v999_v33 = vpop.xlane.xlu1 %998 }
 0x2f8   :  { %v4251_v15 = vsel %vm1049_vm2, %v1043_v39, %v999_v33  ;;  %v4257_v61 = vsel %vm1049_vm2, %v1047_v60, %v1011_v58  ;;  %v3772_v58 = vmov 1  }
 0x2f9   :  { %v1097_v52 = vsel %vm1066_vm4, %v4251_v15, 0.0  ;;  %v1109_v63 = vsel %vm1066_vm4, %v4257_v61, 0.0  ;;  %3647 = vset.pattern.permute.xlu1 %v3772_v58  ;;  %3648 = vset.pattern.permute.xlu0 %v3772_v58 }
 0x2fa   :  { %1098 = vadd.xlane.f32.xlu0 %v1097_v52 }
 0x2fe   :  { %1110 = vadd.xlane.f32.xlu0 %v1109_v63 }
 0x32d   :  { %v1084_v0 = vpop.xlane.xlu1 %1083 }
 0x32e   :  { %v1121_v2 = vmul.f32 0.25, %v1084_v0 }
 0x330   :  { %v4262_v47 = vsub.f32 %v4138_v55, %v1121_v2 }
 0x332   :  { %v1153_v3 = vmul.f32 %v4262_v47, %v4262_v47 }
 0x334   :  { %v1072_v4 = vpop.xlane.xlu0 %1071  ;;  %v1179_v5 = vsel %vm1066_vm4, %v1153_v3, 0.0 }
 0x335   :  { %v1117_v32 = vmul.f32 0.25, %v1072_v4  ;;  %1180 = vadd.xlane.f32.xlu1 %v1179_v5 }
 0x337   :  { %v4268_v11 = vsub.f32 %v4146_v59, %v1117_v32 }
 0x338   :  { %v1096_v31 = vpop.xlane.xlu1 %1095 }
 0x339   :  { %v1125_v45 = vmul.f32 0.25, %v1096_v31  ;;  %v1149_v16 = vmul.f32 %v4268_v11, %v4268_v11 }
 0x33b   :  { %v4273_v23 = vsub.f32 %v4154_v10, %v1125_v45  ;;  %v1167_v55 = vsel %vm1066_vm4, %v1149_v16, 0.0 }
 0x33c   :  { %1168 = vadd.xlane.f32.xlu0 %v1167_v55  ;;  %v1108_v17 = vpop.xlane.xlu1 %1107 }
 0x33d   :  { %v1129_v34 = vmul.f32 0.25, %v1108_v17  ;;  %v1157_v19 = vmul.f32 %v4273_v23, %v4273_v23 }
 0x33f   :  { %v4279_v22 = vsub.f32 %v4162_v12, %v1129_v34  ;;  %v1191_v59 = vsel %vm1066_vm4, %v1157_v19, 0.0 }
 0x340   :  { %1192 = vadd.xlane.f32.xlu1 %v1191_v59 }
 0x341   :  { %v1161_v57 = vmul.f32 %v4279_v22, %v4279_v22 }
 0x343   :  { %v1203_v10 = vsel %vm1066_vm4, %v1161_v57, 0.0 }
 0x344   :  { %1204 = vadd.xlane.f32.xlu1 %v1203_v10 }
 0x349   :  { %v1081_v24 = vpop.xlane.xlu1 %1080 }
 0x34a   :  { %v1120_v25 = vmul.f32 0.25, %v1081_v24 }
 0x34c   :  { %v4286_v38 = vsub.f32 %v4169_v18, %v1120_v25 }
 0x34e   :  { %v1152_v37 = vmul.f32 %v4286_v38, %v4286_v38 }
 0x350   :  { %v1069_v27 = vpop.xlane.xlu0 %1068  ;;  %v1176_v12 = vsel %vm1066_vm4, %v1152_v37, 0.0 }
 0x351   :  { %v1116_v40 = vmul.f32 0.25, %v1069_v27  ;;  %1177 = vadd.xlane.f32.xlu1 %v1176_v12 }
 0x353   :  { %v4292_v48 = vsub.f32 %v4181_v43, %v1116_v40 }
 0x354   :  { %v1093_v50 = vpop.xlane.xlu0 %1092 }
 0x355   :  { %v1124_v51 = vmul.f32 0.25, %v1093_v50  ;;  %v1148_v36 = vmul.f32 %v4292_v48, %v4292_v48 }
 0x357   :  { %v4297_v42 = vsub.f32 %v4188_v53, %v1124_v51  ;;  %v1164_v18 = vsel %vm1066_vm4, %v1148_v36, 0.0 }
 0x358   :  { %v1105_v54 = vpop.xlane.xlu0 %1104  ;;  %1165 = vadd.xlane.f32.xlu0 %v1164_v18 }
 0x359   :  { %v1128_v9 = vmul.f32 0.25, %v1105_v54  ;;  %v1156_v56 = vmul.f32 %v4297_v42, %v4297_v42 }
 0x35b   :  { %v4303_v46 = vsub.f32 %v4193_v7, %v1128_v9  ;;  %v1188_v43 = vsel %vm1066_vm4, %v1156_v56, 0.0 }
 0x35c   :  { %1189 = vadd.xlane.f32.xlu0 %v1188_v43 }
 0x35d   :  { %v1160_v39 = vmul.f32 %v4303_v46, %v4303_v46 }
 0x35f   :  { %v1200_v53 = vsel %vm1066_vm4, %v1160_v39, 0.0 }
 0x360   :  { %1201 = vadd.xlane.f32.xlu0 %v1200_v53 }
 0x367   :  { %v1078_v33 = vpop.xlane.xlu0 %1077 }
 0x368   :  { %v1119_v35 = vmul.f32 0.25, %v1078_v33 }
 0x36a   :  { %v4312_v60 = vsub.f32 %v4201_v62, %v1119_v35 }
 0x36b   :  { %v1090_v7 = vpop.xlane.xlu1 %1089 }
 0x36c   :  { %v1123_v52 = vmul.f32 0.25, %v1090_v7  ;;  %v1151_v63 = vmul.f32 %v4312_v60, %v4312_v60 }
 0x36e   :  { %v4317_v0 = vsub.f32 %v4211_v8, %v1123_v52  ;;  %v1173_v2 = vsel %vm1066_vm4, %v1151_v63, 0.0 }
 0x36f   :  { %1174 = vadd.xlane.f32.xlu0 %v1173_v2  ;;  %v1102_v3 = vpop.xlane.xlu1 %1101  ;;  %v1278_v2 = vsub.s32 1, %v3842_v49 }
 0x370   :  { %v1127_v4 = vmul.f32 0.25, %v1102_v3  ;;  %v1155_v5 = vmul.f32 %v4317_v0, %v4317_v0 }
 0x372   :  { %v4323_v32 = vsub.f32 %v4217_v14, %v1127_v4  ;;  %v1185_v62 = vsel %vm1066_vm4, %v1155_v5, 0.0  ;;  %v3743_v5 = vld [vmem:[%s5105_s2 + $0x10] sm:$0xff] }
 0x373   :  { %1186 = vadd.xlane.f32.xlu1 %v1185_v62  ;;  %v1114_v31 = vpop.xlane.xlu1 %1113  ;;  %v4363_v62 = vrot.slane %v3743_v5, %v1278_v2 }
 0x374   :  { %v1131_v45 = vmul.f32 0.25, %v1114_v31  ;;  %v1159_v8 = vmul.f32 %v4323_v32, %v4323_v32  ;;  %v1298_v31 = vsub.s32 2, %v3842_v49 }
 0x376   :  { %v4329_v16 = vsub.f32 %v4225_v13, %v1131_v45  ;;  %v1197_v55 = vsel %vm1066_vm4, %v1159_v8, 0.0 }
 0x377   :  { %1198 = vadd.xlane.f32.xlu1 %v1197_v55 }
 0x378   :  { %v1163_v17 = vmul.f32 %v4329_v16, %v4329_v16 }
 0x37a   :  { %v1209_v14 = vsel %vm1066_vm4, %v1163_v17, 0.0  ;;  %v4368_v17 = vrot.slane %v3743_v5, %v1298_v31 }
 0x37b   :  { %1210 = vadd.xlane.f32.xlu1 %v1209_v14 }
 0x37f   :  { %v1087_v34 = vpop.xlane.xlu1 %1086 }
 0x380   :  { %v1122_v19 = vmul.f32 0.25, %v1087_v34 }
 0x382   :  { %v4336_v59 = vsub.f32 %v4233_v44, %v1122_v19 }
 0x383   :  { %v1075_v57 = vpop.xlane.xlu0 %1074 }
 0x384   :  { %v1118_v10 = vmul.f32 0.25, %v1075_v57  ;;  %v1154_v13 = vmul.f32 %v4336_v59, %v4336_v59 }
 0x386   :  { %v4341_v24 = vsub.f32 %v4241_v41, %v1118_v10  ;;  %v1182_v25 = vsel %vm1066_vm4, %v1154_v13, 0.0 }
 0x387   :  { %v1099_v37 = vpop.xlane.xlu0 %1098  ;;  %1183 = vadd.xlane.f32.xlu1 %v1182_v25 }
 0x388   :  { %v1126_v27 = vmul.f32 0.25, %v1099_v37  ;;  %v1150_v12 = vmul.f32 %v4341_v24, %v4341_v24 }
 0x38a   :  { %v4347_v40 = vsub.f32 %v4251_v15, %v1126_v27  ;;  %v1170_v44 = vsel %vm1066_vm4, %v1150_v12, 0.0 }
 0x38b   :  { %1171 = vadd.xlane.f32.xlu0 %v1170_v44  ;;  %v1111_v50 = vpop.xlane.xlu0 %1110 }
 0x38c   :  { %v1130_v51 = vmul.f32 0.25, %v1111_v50  ;;  %v1158_v41 = vmul.f32 %v4347_v40, %v4347_v40 }
 0x38e   :  { %v4353_v36 = vsub.f32 %v4257_v61, %v1130_v51  ;;  %v1194_v18 = vsel %vm1066_vm4, %v1158_v41, 0.0 }
 0x38f   :  { %1195 = vadd.xlane.f32.xlu0 %v1194_v18 }
 0x390   :  { %v1162_v54 = vmul.f32 %v4353_v36, %v4353_v36 }
 0x392   :  { %v1206_v15 = vsel %vm1066_vm4, %v1162_v54, 0.0 }
 0x393   :  { %1207 = vadd.xlane.f32.xlu0 %v1206_v15 }
 0x3c2   :  { %v1181_v9 = vpop.xlane.xlu1 %1180 }
 0x3c3   :  { %v1217_v56 = vmul.f32 0.25, %v1181_v9 }
 0x3c5   :  { %v1233_v43 = vadd.f32 1e-05, %v1217_v56 }
 0x3c7   :  { %3679 = vrsqrt.f32 %v1233_v43 }
 0x3c9   :  { %v1169_v39 = vpop.xlane.xlu0 %1168 }
 0x3ca   :  { %v1213_v53 = vmul.f32 0.25, %v1169_v39 }
 0x3cc   :  { %v1229_v33 = vadd.f32 1e-05, %v1213_v53 }
 0x3cd   :  { %v1193_v35 = vpop.xlane.xlu1 %1192 }
 0x3ce   :  { %3681 = vrsqrt.f32 %v1229_v33  ;;  %v1221_v61 = vmul.f32 0.25, %v1193_v35  ;;  %v3773_v33 = vmov 2  }
 0x3d0   :  { %v1237_v7 = vadd.f32 1e-05, %v1221_v61 }
 0x3d1   :  { %v1205_v52 = vpop.xlane.xlu1 %1204  ;;  %v3680_v3 = vpop.eup %3679 }
 0x3d2   :  { %3683 = vrsqrt.f32 %v1237_v7  ;;  %v1225_v63 = vmul.f32 0.25, %v1205_v52  ;;  %v1265_v45 = vmul.f32 %v3680_v3, %v4262_v47  ;;  %v3774_v7 = vmov 3  }
 0x3d4   :  { %v1241_v4 = vadd.f32 1e-05, %v1225_v63  ;;  %v1285_v34 = vmul.f32 %v4363_v62, %v1265_v45 }
 0x3d6   :  { %3685 = vrsqrt.f32 %v1241_v4  ;;  %v1305_v37 = vadd.f32 %v4368_v17, %v1285_v34 }
 0x3d8   :  { %v3682_v8 = vpop.eup %3681  ;;  %v1321_v44 = vmax.f32 %v1305_v37, 0.0 }
 0x3d9   :  { %v1261_v55 = vmul.f32 %v3682_v8, %v4268_v11  ;;  %v3775_v8 = vmov 0  }
 0x3db   :  { %v1281_v14 = vmul.f32 %v4363_v62, %v1261_v55 }
 0x3dc   :  { %v3684_v19 = vpop.eup %3683 }
 0x3dd   :  { %v1301_v57 = vadd.f32 %v4368_v17, %v1281_v14  ;;  %v1269_v10 = vmul.f32 %v3684_v19, %v4273_v23 }
 0x3de   :  { %v1178_v13 = vpop.xlane.xlu1 %1177 }
 0x3df   :  { %v1317_v25 = vmax.f32 %v1301_v57, 0.0  ;;  %v1289_v47 = vmul.f32 %v4363_v62, %v1269_v10  ;;  %v1216_v12 = vmul.f32 0.25, %v1178_v13 }
 0x3e0   :  { %v3686_v27 = vpop.eup %3685 }
 0x3e1   :  { %1433 = vperm.xlu1 %3647, %v1317_v25   ;;  %v1273_v11 = vmul.f32 %v3686_v27, %v4279_v22  ;;  %v1309_v50 = vadd.f32 %v4368_v17, %v1289_v47  ;;  %v1232_v18 = vadd.f32 1e-05, %v1216_v12 }
 0x3e3   :  { %v1293_v51 = vmul.f32 %v4363_v62, %v1273_v11  ;;  %v1325_v54 = vmax.f32 %v1309_v50, 0.0  ;;  %3687 = vrsqrt.f32 %v1232_v18 }
 0x3e5   :  { %v1166_v41 = vpop.xlane.xlu0 %1165  ;;  %1449 = vperm.xlu1 %3647, %v1321_v44   ;;  %v1313_v23 = vadd.f32 %v4368_v17, %v1293_v51 }
 0x3e6   :  { %v1212_v9 = vmul.f32 0.25, %v1166_v41 }
 0x3e7   :  { %v4380_v15 = vmax.f32 %v1313_v23, 0.0 }
 0x3e8   :  { %v1228_v39 = vadd.f32 1e-05, %v1212_v9 }
 0x3e9   :  { %v1190_v56 = vpop.xlane.xlu0 %1189  ;;  %1465 = vperm.xlu1 %3647, %v1325_v54   ;;  %1481 = vperm.xlu0 %3648, %v4380_v15  }
 0x3ea   :  { %v1220_v22 = vmul.f32 0.25, %v1190_v56 }
 0x3ec   :  { %v1236_v43 = vadd.f32 1e-05, %v1220_v22 }
 0x3ed   :  { %v1202_v53 = vpop.xlane.xlu0 %1201  ;;  %3649 = vset.pattern.permute.xlu1 %v3773_v33  ;;  %3650 = vset.pattern.permute.xlu0 %v3773_v33  ;;  %v3688_v52 = vpop.eup %3687 }
 0x3ee   :  { %3689 = vrsqrt.f32 %v1236_v43  ;;  %v1224_v35 = vmul.f32 0.25, %v1202_v53  ;;  %1593 = vperm.xlu1 %3649, %v1317_v25   ;;  %1609 = vperm.xlu0 %3650, %v1321_v44   ;;  %v1264_v63 = vmul.f32 %v3688_v52, %v4286_v38 }
 0x3ef   :  { %3691 = vrsqrt.f32 %v1228_v39 }
 0x3f0   :  { %v1240_v61 = vadd.f32 1e-05, %v1224_v35  ;;  %v1284_v4 = vmul.f32 %v4363_v62, %v1264_v63 }
 0x3f2   :  { %3693 = vrsqrt.f32 %v1240_v61  ;;  %1625 = vperm.xlu1 %3649, %v1325_v54   ;;  %3652 = vset.pattern.permute.xlu0 %v3774_v7  ;;  %v1304_v38 = vadd.f32 %v4368_v17, %v1284_v4 }
 0x3f3   :  { %1769 = vperm.xlu0 %3652, %v1321_v44  }
 0x3f4   :  { %v4399_v10 = vmax.f32 %v1304_v38, 0.0 }
 0x3f6   :  { %1641 = vperm.xlu1 %3649, %v4380_v15  }
 0x3f7   :  { %1785 = vperm.xlu0 %3652, %v1325_v54  }
 0x3f8   :  { %v3690_v2 = vpop.eup %3689 }
 0x3f9   :  { %v3692_v3 = vpop.eup %3691  ;;  %v1268_v5 = vmul.f32 %v3690_v2, %v4297_v42 }
 0x3fa   :  { %3651 = vset.pattern.permute.xlu1 %v3774_v7  ;;  %v1260_v45 = vmul.f32 %v3692_v3, %v4292_v48 }
 0x3fb   :  { %1753 = vperm.xlu1 %3651, %v1317_v25   ;;  %1801 = vperm.xlu0 %3652, %v4380_v15   ;;  %v1288_v55 = vmul.f32 %v4363_v62, %v1268_v5 }
 0x3fc   :  { %v3694_v31 = vpop.eup %3693  ;;  %v1280_v42 = vmul.f32 %v4363_v62, %v1260_v45  ;;  %v1175_v37 = vpop.xlane.xlu0 %1174 }
 0x3fd   :  { %v1272_v14 = vmul.f32 %v3694_v31, %v4303_v46  ;;  %v1308_v48 = vadd.f32 %v4368_v17, %v1288_v55 }
 0x3fe   :  { %v1300_v46 = vadd.f32 %v4368_v17, %v1280_v42 }
 0x3ff   :  { %3653 = vset.pattern.permute.xlu1 %v3775_v8  ;;  %3654 = vset.pattern.permute.xlu0 %v3775_v8  ;;  %v1292_v13 = vmul.f32 %v4363_v62, %v1272_v14  ;;  %v4406_v12 = vmax.f32 %v1308_v48, 0.0 }
 0x400   :  { %1339 = vperm.xlu1 %3653, %v1317_v25   ;;  %1359 = vperm.xlu0 %3654, %v1321_v44   ;;  %v1187_v34 = vpop.xlane.xlu1 %1186  ;;  %v1215_v25 = vmul.f32 0.25, %v1175_v37  ;;  %v1316_v51 = vmax.f32 %v1300_v46, 0.0 }
 0x401   :  { %v1219_v19 = vmul.f32 0.25, %v1187_v34  ;;  %v1312_v44 = vadd.f32 %v4368_v17, %v1292_v13 }
 0x402   :  { %v1231_v50 = vadd.f32 1e-05, %v1215_v25 }
 0x403   :  { %v1235_v57 = vadd.f32 1e-05, %v1219_v19  ;;  %v4411_v41 = vmax.f32 %v1312_v44, 0.0 }
 0x404   :  { %3656 = vset.pattern.permute.xlu1 %v3772_v58  ;;  %1379 = vperm.xlu0 %3654, %v1325_v54   ;;  %v1199_v47 = vpop.xlane.xlu1 %1198 }
 0x405   :  { %v1223_v27 = vmul.f32 0.25, %v1199_v47  ;;  %1445 = vperm.xlu1 %3656, %v4399_v10   ;;  %3695 = vrsqrt.f32 %v1235_v57 }
 0x407   :  { %v1239_v11 = vadd.f32 1e-05, %v1223_v27 }
 0x408   :  { %1399 = vperm.xlu0 %3654, %v4380_v15   ;;  %v1211_v18 = vpop.xlane.xlu1 %1210 }
 0x409   :  { %1461 = vperm.xlu1 %3656, %v4406_v12   ;;  %3697 = vrsqrt.f32 %v1239_v11  ;;  %v1227_v38 = vmul.f32 0.25, %v1211_v18 }
 0x40a   :  { %3699 = vrsqrt.f32 %v1231_v50 }
 0x40b   :  { %v1243_v42 = vadd.f32 1e-05, %v1227_v38 }
 0x40c   :  { %3655 = vset.pattern.permute.xlu0 %v3772_v58 }
 0x40d   :  { %1429 = vperm.xlu0 %3655, %v1316_v51   ;;  %1477 = vperm.xlu1 %3656, %v4411_v41  }
 0x40f   :  { %v3696_v23 = vpop.eup %3695 }
 0x410   :  { %v1267_v54 = vmul.f32 %v3696_v23, %v4317_v0 }
 0x411   :  { %3658 = vset.pattern.permute.xlu0 %v3773_v33  ;;  %3657 = vset.pattern.permute.xlu1 %v3773_v33 }
 0x412   :  { %1637 = vperm.xlu0 %3658, %v4411_v41   ;;  %1589 = vperm.xlu1 %3657, %v1316_v51   ;;  %v1287_v43 = vmul.f32 %v4363_v62, %v1267_v54 }
 0x413   :  { %v3698_v15 = vpop.eup %3697 }
 0x414   :  { %v1184_v9 = vpop.xlane.xlu1 %1183  ;;  %v1271_v39 = vmul.f32 %v3698_v15, %v4323_v32  ;;  %v3700_v35 = vpop.eup %3699  ;;  %v1307_v0 = vadd.f32 %v4368_v17, %v1287_v43 }
 0x415   :  { %v1218_v56 = vmul.f32 0.25, %v1184_v9  ;;  %v1263_v63 = vmul.f32 %v3700_v35, %v4312_v60 }
 0x416   :  { %3660 = vset.pattern.permute.xlu0 %v3774_v7  ;;  %1605 = vperm.xlu1 %3657, %v4399_v10   ;;  %v1291_v61 = vmul.f32 %v4363_v62, %v1271_v39  ;;  %v4430_v32 = vmax.f32 %v1307_v0, 0.0 }
 0x417   :  { %v1234_v22 = vadd.f32 1e-05, %v1218_v56  ;;  %1765 = vperm.xlu0 %3660, %v4399_v10   ;;  %v1283_v31 = vmul.f32 %v4363_v62, %v1263_v63 }
 0x418   :  { %v1172_v53 = vpop.xlane.xlu0 %1171  ;;  %v1311_v4 = vadd.f32 %v4368_v17, %v1291_v61 }
 0x419   :  { %3701 = vrsqrt.f32 %v1234_v22  ;;  %v1214_v55 = vmul.f32 0.25, %v1172_v53  ;;  %v1303_v19 = vadd.f32 %v4368_v17, %v1283_v31 }
 0x41a   :  { %1621 = vperm.xlu1 %3657, %v4406_v12   ;;  %v4437_v34 = vmax.f32 %v1311_v4, 0.0 }
 0x41b   :  { %3661 = vset.pattern.permute.xlu0 %v3775_v8  ;;  %v1230_v48 = vadd.f32 1e-05, %v1214_v55  ;;  %v1319_v13 = vmax.f32 %v1303_v19, 0.0 }
 0x41c   :  { %v1196_v52 = vpop.xlane.xlu0 %1195  ;;  %1334 = vperm.xlu0 %3661, %v1316_v51  }
 0x41d   :  { %v1222_v2 = vmul.f32 0.25, %v1196_v52 }
 0x41e   :  { %3659 = vset.pattern.permute.xlu1 %v3774_v7 }
 0x41f   :  { %v1238_v3 = vadd.f32 1e-05, %v1222_v2  ;;  %1749 = vperm.xlu1 %3659, %v1316_v51  }
 0x420   :  { %v1208_v5 = vpop.xlane.xlu0 %1207  ;;  %3665 = vset.pattern.permute.xlu0 %v3773_v33 }
 0x421   :  { %3703 = vrsqrt.f32 %v1238_v3  ;;  %v1226_v45 = vmul.f32 0.25, %v1208_v5  ;;  %1617 = vperm.xlu0 %3665, %v4430_v32  }
 0x423   :  { %v3702_v60 = vpop.eup %3701  ;;  %v1242_v14 = vadd.f32 1e-05, %v1226_v45  ;;  %1781 = vperm.xlu1 %3659, %v4406_v12  }
 0x424   :  { %v1266_v57 = vmul.f32 %v3702_v60, %v4336_v59 }
 0x425   :  { %3705 = vrsqrt.f32 %v1242_v14  ;;  %1633 = vperm.xlu0 %3665, %v4437_v34  }
 0x426   :  { %3707 = vrsqrt.f32 %v1243_v42  ;;  %v1286_v37 = vmul.f32 %v4363_v62, %v1266_v57 }
 0x427   :  { %1797 = vperm.xlu1 %3659, %v4411_v41   ;;  %3709 = vrsqrt.f32 %v1230_v48 }
 0x428   :  { %v1306_v59 = vadd.f32 %v4368_v17, %v1286_v37 }
 0x429   :  { %3666 = vset.pattern.permute.xlu0 %v3774_v7 }
 0x42a   :  { %1761 = vperm.xlu0 %3666, %v1319_v13   ;;  %v4453_v44 = vmax.f32 %v1306_v59, 0.0 }
 0x42b   :  { %v3704_v47 = vpop.eup %3703  ;;  %3662 = vset.pattern.permute.xlu1 %v3775_v8 }
 0x42c   :  { %1354 = vperm.xlu1 %3662, %v4399_v10   ;;  %v1270_v27 = vmul.f32 %v3704_v47, %v4347_v40 }
 0x42e   :  { %3668 = vset.pattern.permute.xlu0 %v3775_v8  ;;  %v1290_v46 = vmul.f32 %v4363_v62, %v1270_v27 }
 0x42f   :  { %v3706_v25 = vpop.eup %3705  ;;  %1349 = vperm.xlu0 %3668, %v1319_v13  }
 0x430   :  { %1374 = vperm.xlu1 %3662, %v4406_v12   ;;  %v1274_v11 = vmul.f32 %v3706_v25, %v4353_v36  ;;  %v1310_v50 = vadd.f32 %v4368_v17, %v1290_v46  ;;  %v3708_v40 = vpop.eup %3707 }
 0x431   :  { %v3710_v51 = vpop.eup %3709  ;;  %v1275_v12 = vmul.f32 %v3708_v40, %v4329_v16 }
 0x432   :  { %v1294_v10 = vmul.f32 %v4363_v62, %v1274_v11  ;;  %v1326_v23 = vmax.f32 %v1310_v50, 0.0  ;;  %v1262_v36 = vmul.f32 %v3710_v51, %v4341_v24 }
 0x433   :  { %3671 = vset.pattern.permute.xlu0 %v3772_v58  ;;  %v1295_v15 = vmul.f32 %v4363_v62, %v1275_v12 }
 0x434   :  { %1394 = vperm.xlu1 %3662, %v4411_v41   ;;  %1453 = vperm.xlu0 %3671, %v4453_v44   ;;  %v1314_v18 = vadd.f32 %v4368_v17, %v1294_v10  ;;  %v1282_v41 = vmul.f32 %v4363_v62, %v1262_v36 }
 0x435   :  { %v1315_v9 = vadd.f32 %v4368_v17, %v1295_v15 }
 0x436   :  { %v1330_v54 = vmax.f32 %v1314_v18, 0.0  ;;  %v1302_v16 = vadd.f32 %v4368_v17, %v1282_v41 }
 0x437   :  { %v1331_v24 = vmax.f32 %v1315_v9, 0.0 }
 0x438   :  { %3663 = vset.pattern.permute.xlu1 %v3772_v58  ;;  %1469 = vperm.xlu0 %3671, %v1326_v23   ;;  %v1318_v56 = vmax.f32 %v1302_v16, 0.0 }
 0x439   :  { %1441 = vperm.xlu1 %3663, %v1319_v13  }
 0x43c   :  { %1485 = vperm.xlu0 %3671, %v1330_v54  }
 0x43d   :  { %1457 = vperm.xlu1 %3663, %v4430_v32  }
 0x440   :  { %3673 = vset.pattern.permute.xlu0 %v3773_v33 }
 0x441   :  { %1473 = vperm.xlu1 %3663, %v4437_v34   ;;  %1613 = vperm.xlu0 %3673, %v4453_v44  }
 0x445   :  { %1489 = vperm.xlu1 %3663, %v1331_v24   ;;  %3674 = vset.pattern.permute.xlu0 %v3774_v7 }
 0x446   :  { %1757 = vperm.xlu0 %3674, %v1318_v56  }
 0x449   :  { %3664 = vset.pattern.permute.xlu1 %v3773_v33 }
 0x44a   :  { %1601 = vperm.xlu1 %3664, %v1319_v13   ;;  %1789 = vperm.xlu0 %3674, %v1326_v23  }
 0x44e   :  { %1649 = vperm.xlu1 %3664, %v1331_v24   ;;  %1805 = vperm.xlu0 %3674, %v1330_v54  }
 0x452   :  { %3667 = vset.pattern.permute.xlu1 %v3774_v7  ;;  %3676 = vset.pattern.permute.xlu0 %v3775_v8 }
 0x453   :  { %1777 = vperm.xlu1 %3667, %v4430_v32   ;;  %1344 = vperm.xlu0 %3676, %v1318_v56  }
 0x457   :  { %1793 = vperm.xlu1 %3667, %v4437_v34   ;;  %1384 = vperm.xlu0 %3676, %v1326_v23  }
 0x45b   :  { %1809 = vperm.xlu1 %3667, %v1331_v24   ;;  %1404 = vperm.xlu0 %3676, %v1330_v54  }
 0x45f   :  { %3669 = vset.pattern.permute.xlu1 %v3775_v8 }
 0x460   :  { %1369 = vperm.xlu1 %3669, %v4430_v32   ;;  %v1434_v62 = vpop.permute.xlu1 %1433 }
 0x461   :  { %v1493_v14 = vmul.f32 %v1434_v62, %v3848_v1 }
 0x464   :  { %1389 = vperm.xlu1 %3669, %v4437_v34   ;;  %v1450_v17 = vpop.permute.xlu1 %1449 }
 0x465   :  { %v1497_v22 = vmul.f32 %v1450_v17, %v3848_v1 }
 0x467   :  { %1534 = vrot.lane.b32.xlu0 %v1497_v22, %s3770_s26 }
 0x468   :  { %v1482_v43 = vpop.permute.xlu0 %1481  ;;  %1409 = vperm.xlu1 %3669, %v1331_v24   ;;  %v1466_v39 = vpop.permute.xlu1 %1465 }
 0x469   :  { %v1501_v53 = vmul.f32 %v1466_v39, %v3848_v1  ;;  %v1505_v35 = vmul.f32 %v1482_v43, %v3848_v1 }
 0x46b   :  { %1542 = vrot.lane.b32.xlu0 %v1501_v53, %s3770_s26 }
 0x46c   :  { %3670 = vset.pattern.permute.xlu1 %v3772_v58 }
 0x46d   :  { %v1610_v0 = vpop.permute.xlu0 %1609  ;;  %1437 = vperm.xlu1 %3670, %v1318_v56   ;;  %v1594_v61 = vpop.permute.xlu1 %1593 }
 0x46e   :  { %v1657_v52 = vmul.f32 %v1610_v0, %v3848_v1  ;;  %v1653_v57 = vmul.f32 %v1594_v61, %v3848_v1 }
 0x46f   :  { %1550 = vrot.lane.b32.xlu0 %v1505_v35, %s3770_s26 }
 0x471   :  { %3672 = vset.pattern.permute.xlu1 %v3773_v33  ;;  %v1626_v63 = vpop.permute.xlu1 %1625 }
 0x472   :  { %v1770_v2 = vpop.permute.xlu0 %1769  ;;  %1597 = vperm.xlu1 %3672, %v1318_v56   ;;  %v1661_v13 = vmul.f32 %v1626_v63, %v3848_v1 }
 0x473   :  { %1694 = vrot.lane.b32.xlu0 %v1657_v52, %s3771_s27  ;;  %v1817_v25 = vmul.f32 %v1770_v2, %v3848_v1 }
 0x475   :  { %v1642_v3 = vpop.permute.xlu1 %1641 }
 0x476   :  { %v1786_v32 = vpop.permute.xlu0 %1785  ;;  %1629 = vperm.xlu1 %3672, %v1326_v23   ;;  %v1665_v27 = vmul.f32 %v1642_v3, %v3848_v1 }
 0x477   :  { %v1821_v31 = vmul.f32 %v1786_v32, %v3848_v1 }
 0x47a   :  { %v1802_v58 = vpop.permute.xlu0 %1801  ;;  %1645 = vperm.xlu1 %3672, %v1330_v54   ;;  %v1754_v4 = vpop.permute.xlu1 %1753 }
 0x47b   :  { %v1813_v5 = vmul.f32 %v1754_v4, %v3848_v1  ;;  %v1825_v38 = vmul.f32 %v1802_v58, %v3848_v1 }
 0x47d   :  { %1846 = vrot.lane.b32.xlu0 %v1813_v5, %s3769_s25 }
 0x47e   :  { %3675 = vset.pattern.permute.xlu1 %v3774_v7 }
 0x47f   :  { %v4495_v33 = vpop.permute.xlu0 %1359  ;;  %1773 = vperm.xlu1 %3675, %v4453_v44   ;;  %v4498_v45 = vpop.permute.xlu1 %1339 }
 0x481   :  { %1862 = vrot.lane.b32.xlu0 %v1821_v31, %s3769_s25 }
 0x483   :  { %v4502_v60 = vpop.permute.xlu0 %1379  ;;  %3677 = vset.pattern.permute.xlu1 %v3775_v8 }
 0x484   :  { %1364 = vperm.xlu1 %3677, %v4453_v44   ;;  %v1446_v55 = vpop.permute.xlu1 %1445 }
 0x485   :  { %1870 = vrot.lane.b32.xlu0 %v1825_v38, %s3769_s25  ;;  %v1496_v34 = vmul.f32 %v1446_v55, %v3854_v6 }
 0x487   :  { %v4509_v19 = vpop.permute.xlu0 %1399 }
 0x488   :  { %1526 = vrot.lane.b32.xlu1 %v1493_v14, %s3770_s26  ;;  %v1462_v42 = vpop.permute.xlu1 %1461 }
 0x489   :  { %1532 = vrot.lane.b32.xlu0 %v1496_v34, %s3770_s26  ;;  %v1500_v23 = vmul.f32 %v1462_v42, %v3854_v6 }
 0x48c   :  { %v1430_v48 = vpop.permute.xlu0 %1429  ;;  %1686 = vrot.lane.b32.xlu1 %v1653_v57, %s3771_s27  ;;  %v1478_v8 = vpop.permute.xlu1 %1477 }
 0x48d   :  { %v1492_v10 = vmul.f32 %v1430_v48, %v3854_v6  ;;  %v1504_v36 = vmul.f32 %v1478_v8, %v3854_v6 }
 0x490   :  { %1702 = vrot.lane.b32.xlu1 %v1661_v13, %s3771_s27 }
 0x491   :  { %v1638_v37 = vpop.permute.xlu0 %1637  ;;  %v1590_v47 = vpop.permute.xlu1 %1589 }
 0x492   :  { %v1652_v59 = vmul.f32 %v1590_v47, %v3854_v6  ;;  %v1664_v11 = vmul.f32 %v1638_v37, %v3854_v6 }
 0x494   :  { %1710 = vrot.lane.b32.xlu1 %v1665_v27, %s3771_s27  ;;  %1684 = vrot.lane.b32.xlu0 %v1652_v59, %s3771_s27 }
 0x495   :  { %v1606_v46 = vpop.permute.xlu1 %1605 }
 0x496   :  { %v1766_v44 = vpop.permute.xlu0 %1765  ;;  %v1656_v9 = vmul.f32 %v1606_v46, %v3854_v6 }
 0x497   :  { %v1816_v40 = vmul.f32 %v1766_v44, %v3854_v6 }
 0x498   :  { %1854 = vrot.lane.b32.xlu1 %v1817_v25, %s3769_s25  ;;  %1708 = vrot.lane.b32.xlu0 %v1664_v11, %s3771_s27 }
 0x499   :  { %v1622_v50 = vpop.permute.xlu1 %1621 }
 0x49a   :  { %v1660_v56 = vmul.f32 %v1622_v50, %v3854_v6 }
 0x49b   :  { %v4527_v51 = vpop.permute.xlu0 %1334 }
 0x49c   :  { %1524 = vrot.lane.b32.xlu1 %v1492_v10, %s3770_s26  ;;  %1852 = vrot.lane.b32.xlu0 %v1816_v40, %s3769_s25 }
 0x49e   :  { %v1750_v18 = vpop.permute.xlu1 %1749 }
 0x49f   :  { %v1812_v17 = vmul.f32 %v1750_v18, %v3854_v6 }
 0x4a0   :  { %v1618_v12 = vpop.permute.xlu0 %1617  ;;  %1540 = vrot.lane.b32.xlu1 %v1500_v23, %s3770_s26 }
 0x4a1   :  { %v1659_v38 = vmul.f32 %v1618_v12, %v3911_v26 }
 0x4a2   :  { %v1782_v54 = vpop.permute.xlu1 %1781 }
 0x4a3   :  { %v1820_v15 = vmul.f32 %v1782_v54, %v3854_v6 }
 0x4a4   :  { %v1634_v41 = vpop.permute.xlu0 %1633  ;;  %1548 = vrot.lane.b32.xlu1 %v1504_v36, %s3770_s26 }
 0x4a5   :  { %1860 = vrot.lane.b32.xlu0 %v1820_v15, %s3769_s25  ;;  %v1663_v42 = vmul.f32 %v1634_v41, %v3911_v26 }
 0x4a6   :  { %v1798_v16 = vpop.permute.xlu1 %1797 }
 0x4a7   :  { %v1824_v39 = vmul.f32 %v1798_v16, %v3854_v6 }
 0x4a8   :  { %1692 = vrot.lane.b32.xlu1 %v1656_v9, %s3771_s27 }
 0x4a9   :  { %v1762_v24 = vpop.permute.xlu0 %1761 }
 0x4aa   :  { %v1815_v48 = vmul.f32 %v1762_v24, %v3911_v26 }
 0x4ab   :  { %v4540_v62 = vpop.permute.xlu1 %1354 }
 0x4ac   :  { %1700 = vrot.lane.b32.xlu1 %v1660_v56, %s3771_s27 }
 0x4ae   :  { %v4544_v22 = vpop.permute.xlu0 %1349 }
 0x4af   :  { %v4546_v43 = vpop.permute.xlu1 %1374 }
 0x4b0   :  { %1844 = vrot.lane.b32.xlu1 %v1812_v17, %s3769_s25 }
 0x4b3   :  { %v1454_v53 = vpop.permute.xlu0 %1453  ;;  %v4550_v35 = vpop.permute.xlu1 %1394 }
 0x4b4   :  { %1868 = vrot.lane.b32.xlu1 %v1824_v39, %s3769_s25  ;;  %v1498_v11 = vmul.f32 %v1454_v53, %v3920_v30 }
 0x4b7   :  { %v1470_v61 = vpop.permute.xlu0 %1469 }
 0x4b8   :  { %v1442_v0 = vpop.permute.xlu1 %1441  ;;  %v1502_v15 = vmul.f32 %v1470_v61, %v3920_v30 }
 0x4b9   :  { %v1495_v52 = vmul.f32 %v1442_v0, %v3911_v26 }
 0x4bb   :  { %1530 = vrot.lane.b32.xlu1 %v1495_v52, %s3770_s26  ;;  %v1486_v3 = vpop.permute.xlu0 %1485 }
 0x4bc   :  { %v1458_v63 = vpop.permute.xlu1 %1457  ;;  %v1506_v16 = vmul.f32 %v1486_v3, %v3920_v30 }
 0x4bd   :  { %v1499_v2 = vmul.f32 %v1458_v63, %v3911_v26 }
 0x4bf   :  { %1538 = vrot.lane.b32.xlu0 %v1499_v2, %s3770_s26 }
 0x4c0   :  { %v1474_v32 = vpop.permute.xlu1 %1473  ;;  %v1614_v5 = vpop.permute.xlu0 %1613 }
 0x4c1   :  { %v1503_v58 = vmul.f32 %v1474_v32, %v3911_v26  ;;  %v1658_v39 = vmul.f32 %v1614_v5, %v3920_v30 }
 0x4c3   :  { %1546 = vrot.lane.b32.xlu0 %v1503_v58, %s3770_s26 }
 0x4c4   :  { %v1490_v4 = vpop.permute.xlu1 %1489 }
 0x4c5   :  { %v1507_v31 = vmul.f32 %v1490_v4, %v3911_v26  ;;  %v1758_v34 = vpop.permute.xlu0 %1757 }
 0x4c6   :  { %v1814_v17 = vmul.f32 %v1758_v34, %v3920_v30 }
 0x4c7   :  { %1554 = vrot.lane.b32.xlu0 %v1507_v31, %s3770_s26  ;;  %v1413_v31 = vmul.f32 %v4498_v45, %v3848_v1 }
 0x4c9   :  { %v1602_v55 = vpop.permute.xlu1 %1601  ;;  %v1790_v8 = vpop.permute.xlu0 %1789 }
 0x4ca   :  { %v1655_v14 = vmul.f32 %v1602_v55, %v3911_v26 }
 0x4cb   :  { %1698 = vrot.lane.b32.xlu0 %v1659_v38, %s3771_s27  ;;  %v1822_v38 = vmul.f32 %v1790_v8, %v3920_v30  ;;  %v1421_v8 = vmul.f32 %v4502_v60, %v3848_v1 }
 0x4cc   :  { %1690 = vrot.lane.b32.xlu1 %v1655_v14, %s3771_s27 }
 0x4cd   :  { %v1650_v57 = vpop.permute.xlu1 %1649  ;;  %v1806_v59 = vpop.permute.xlu0 %1805 }
 0x4ce   :  { %v1667_v13 = vmul.f32 %v1650_v57, %v3911_v26  ;;  %v1826_v34 = vmul.f32 %v1806_v59, %v3920_v30 }
 0x4cf   :  { %1706 = vrot.lane.b32.xlu0 %v1663_v42, %s3771_s27 }
 0x4d0   :  { %1850 = vrot.lane.b32.xlu1 %v1815_v48, %s3769_s25 }
 0x4d2   :  { %v1778_v37 = vpop.permute.xlu1 %1777  ;;  %v4576_v44 = vpop.permute.xlu0 %1344 }
 0x4d3   :  { %1714 = vrot.lane.b32.xlu0 %v1667_v13, %s3771_s27  ;;  %v1819_v47 = vmul.f32 %v1778_v37, %v3911_v26  ;;  %v1417_v37 = vmul.f32 %v4495_v33, %v3848_v1 }
 0x4d6   :  { %v1794_v27 = vpop.permute.xlu1 %1793  ;;  %v4581_v10 = vpop.permute.xlu0 %1384 }
 0x4d7   :  { %1858 = vrot.lane.b32.xlu0 %v1819_v47, %s3769_s25  ;;  %v1823_v46 = vmul.f32 %v1794_v27, %v3911_v26 }
 0x4da   :  { %v1810_v25 = vpop.permute.xlu1 %1809  ;;  %v4587_v18 = vpop.permute.xlu0 %1404 }
 0x4db   :  { %1866 = vrot.lane.b32.xlu0 %v1823_v46, %s3769_s25  ;;  %v1827_v0 = vmul.f32 %v1810_v25, %v3911_v26 }
 0x4de   :  { %v1535_v54 = vpop.permute.xlu0 %1534 }
 0x4df   :  { %1536 = vrot.lane.b32.xlu0 %v1498_v11, %s3770_s26  ;;  %v4579_v50 = vpop.permute.xlu1 %1369  ;;  %v1577_v27 = vadd.f32 %v1535_v54, %v1417_v37  ;;  %v1425_v11 = vmul.f32 %v4509_v19, %v3848_v1 }
 0x4e2   :  { %v1543_v24 = vpop.permute.xlu0 %1542 }
 0x4e3   :  { %v4583_v40 = vpop.permute.xlu1 %1389  ;;  %v1581_v59 = vadd.f32 %v1543_v24, %v1421_v8 }
 0x4e6   :  { %v1551_v61 = vpop.permute.xlu0 %1550 }
 0x4e7   :  { %v4585_v23 = vpop.permute.xlu1 %1409 }
 0x4ea   :  { %v1695_v2 = vpop.permute.xlu0 %1694 }
 0x4eb   :  { %v1737_v46 = vadd.f32 %v1695_v2, %v1577_v27 }
 0x4ec   :  { %v1438_v12 = vpop.permute.xlu1 %1437 }
 0x4ed   :  { %v1494_v36 = vmul.f32 %v1438_v12, %v3920_v30 }
 0x4ef   :  { %1528 = vrot.lane.b32.xlu1 %v1494_v36, %s3770_s26  ;;  %v1847_v4 = vpop.permute.xlu0 %1846 }
 0x4f1   :  { %v1598_v41 = vpop.permute.xlu1 %1597 }
 0x4f2   :  { %v1654_v9 = vmul.f32 %v1598_v41, %v3920_v30 }
 0x4f3   :  { %1544 = vrot.lane.b32.xlu1 %v1502_v15, %s3770_s26  ;;  %v1863_v42 = vpop.permute.xlu0 %1862  ;;  %v1585_v15 = vadd.f32 %v1551_v61, %v1425_v11  ;;  %v1419_v11 = vmul.f32 %v4579_v50, %v3911_v26 }
 0x4f4   :  { %1688 = vrot.lane.b32.xlu0 %v1654_v9, %s3771_s27 }
 0x4f5   :  { %v1630_v56 = vpop.permute.xlu1 %1629 }
 0x4f6   :  { %v1662_v52 = vmul.f32 %v1630_v56, %v3920_v30  ;;  %v1416_v56 = vmul.f32 %v4540_v62, %v3854_v6 }
 0x4f7   :  { %1552 = vrot.lane.b32.xlu1 %v1506_v16, %s3770_s26  ;;  %v1871_v47 = vpop.permute.xlu0 %1870 }
 0x4f8   :  { %1848 = vrot.lane.b32.xlu0 %v1814_v17, %s3769_s25 }
 0x4f9   :  { %v1646_v53 = vpop.permute.xlu1 %1645 }
 0x4fa   :  { %v1666_v3 = vmul.f32 %v1646_v53, %v3920_v30  ;;  %v1412_v53 = vmul.f32 %v4527_v51, %v3854_v6 }
 0x4fb   :  { %1696 = vrot.lane.b32.xlu1 %v1658_v39, %s3771_s27  ;;  %v1533_v33 = vpop.permute.xlu0 %1532 }
 0x4fc   :  { %1874 = vrot.lane.b32.xlu0 %v1827_v0, %s3769_s25  ;;  %v1576_v17 = vadd.f32 %v1533_v33, %v1416_v56 }
 0x4fe   :  { %v1774_v63 = vpop.permute.xlu1 %1773 }
 0x4ff   :  { %1704 = vrot.lane.b32.xlu1 %v1662_v52, %s3771_s27  ;;  %v1818_v58 = vmul.f32 %v1774_v63, %v3920_v30 }
 0x503   :  { %1712 = vrot.lane.b32.xlu1 %v1666_v3, %s3771_s27  ;;  %v4607_v32 = vpop.permute.xlu1 %1364  ;;  %v1420_v3 = vmul.f32 %v4546_v43, %v3854_v6 }
 0x506   :  { %v1685_v60 = vpop.permute.xlu0 %1684 }
 0x507   :  { %1856 = vrot.lane.b32.xlu1 %v1818_v58, %s3769_s25  ;;  %v1527_v5 = vpop.permute.xlu1 %1526 }
 0x508   :  { %v1573_v55 = vadd.f32 %v1527_v5, %v1413_v31  ;;  %v1424_v31 = vmul.f32 %v4550_v35, %v3854_v6  ;;  %v1415_v35 = vmul.f32 %v4544_v22, %v3911_v26 }
 0x50a   :  { %v1709_v1 = vpop.permute.xlu0 %1708 }
 0x50b   :  { %1864 = vrot.lane.b32.xlu1 %v1822_v38, %s3769_s25  ;;  %v1687_v14 = vpop.permute.xlu1 %1686 }
 0x50c   :  { %v1733_v57 = vadd.f32 %v1687_v14, %v1573_v55 }
 0x50e   :  { %v4617_v13 = vadd.f32 %v1847_v4, %v1733_v57  ;;  %v1853_v61 = vpop.permute.xlu0 %1852 }
 0x50f   :  { %1872 = vrot.lane.b32.xlu1 %v1826_v34, %s3769_s25  ;;  %v1703_v48 = vpop.permute.xlu1 %1702 }
 0x510   :  { %v1741_v12 = vadd.f32 %v1703_v48, %v1581_v59 }
 0x512   :  { %v4631_v9 = vadd.f32 %v1863_v42, %v1741_v12 }
 0x513   :  { %1926 = vrot.lane.b32.xlu1 %v4617_v13, %s3776_s9  ;;  %v1711_v45 = vpop.permute.xlu1 %1710 }
 0x514   :  { %v1745_v16 = vadd.f32 %v1711_v45, %v1585_v15  ;;  %v1423_v15 = vmul.f32 %v4583_v40, %v3911_v26  ;;  %v1414_v40 = vmul.f32 %v4576_v44, %v3920_v30  ;;  %v1422_v44 = vmul.f32 %v4581_v10, %v3920_v30 }
 0x516   :  { %v4635_v24 = vadd.f32 %v1871_v47, %v1745_v16 }
 0x517   :  { %v1855_v25 = vpop.permute.xlu1 %1854  ;;  %v1861_v58 = vpop.permute.xlu0 %1860 }
 0x518   :  { %v4627_v36 = vadd.f32 %v1855_v25, %v1737_v46 }
 0x51a   :  { %1934 = vrot.lane.b32.xlu0 %v4627_v36, %s3776_s9 }
 0x51b   :  { %v1525_v41 = vpop.permute.xlu1 %1524 }
 0x51c   :  { %v1572_v52 = vadd.f32 %v1525_v41, %v1412_v53 }
 0x51e   :  { %1942 = vrot.lane.b32.xlu0 %v4631_v9, %s3776_s9  ;;  %v1732_v62 = vadd.f32 %v1685_v60, %v1572_v52 }
 0x51f   :  { %v1541_v54 = vpop.permute.xlu1 %1540 }
 0x520   :  { %v1580_v4 = vadd.f32 %v1541_v54, %v1420_v3 }
 0x522   :  { %1950 = vrot.lane.b32.xlu0 %v4635_v24, %s3776_s9 }
 0x523   :  { %v1549_v19 = vpop.permute.xlu1 %1548 }
 0x524   :  { %v1584_v14 = vadd.f32 %v1549_v19, %v1424_v31  ;;  %v1427_v31 = vmul.f32 %v4585_v23, %v3911_v26 }
 0x526   :  { %v1744_v57 = vadd.f32 %v1709_v1, %v1584_v14 }
 0x527   :  { %v1693_v39 = vpop.permute.xlu1 %1692 }
 0x528   :  { %v1736_v0 = vadd.f32 %v1693_v39, %v1576_v17 }
 0x52a   :  { %v4643_v63 = vadd.f32 %v1853_v61, %v1736_v0 }
 0x52b   :  { %v1701_v2 = vpop.permute.xlu1 %1700 }
 0x52c   :  { %1932 = vrot.lane.b32.xlu0 %v4643_v63, %s3776_s9  ;;  %v1740_v51 = vadd.f32 %v1701_v2, %v1580_v4  ;;  %v1418_v4 = vmul.f32 %v4607_v32, %v3920_v30 }
 0x52e   :  { %v4655_v34 = vadd.f32 %v1861_v58, %v1740_v51 }
 0x52f   :  { %v1845_v5 = vpop.permute.xlu1 %1844 }
 0x530   :  { %v4651_v38 = vadd.f32 %v1845_v5, %v1732_v62 }
 0x531   :  { %v1539_v55 = vpop.permute.xlu0 %1538 }
 0x532   :  { %1924 = vrot.lane.b32.xlu1 %v4651_v38, %s3776_s9  ;;  %v1579_v33 = vadd.f32 %v1539_v55, %v1419_v11 }
 0x533   :  { %v1869_v43 = vpop.permute.xlu1 %1868 }
 0x534   :  { %v4659_v48 = vadd.f32 %v1869_v43, %v1744_v57 }
 0x535   :  { %v1547_v42 = vpop.permute.xlu0 %1546 }
 0x536   :  { %1940 = vrot.lane.b32.xlu1 %v4655_v34, %s3776_s9  ;;  %v1583_v16 = vadd.f32 %v1547_v42, %v1423_v15 }
 0x537   :  { %v1531_v6 = vpop.permute.xlu1 %1530 }
 0x538   :  { %v1575_v8 = vadd.f32 %v1531_v6, %v1415_v35  ;;  %v1426_v6 = vmul.f32 %v4587_v18, %v3920_v30 }
 0x539   :  { %v1555_v37 = vpop.permute.xlu0 %1554 }
 0x53a   :  { %1948 = vrot.lane.b32.xlu1 %v4659_v48, %s3776_s9  ;;  %v1587_v14 = vadd.f32 %v1555_v37, %v1427_v31 }
 0x53d   :  { %v1699_v47 = vpop.permute.xlu0 %1698 }
 0x53e   :  { %v1691_v45 = vpop.permute.xlu1 %1690  ;;  %v1739_v22 = vadd.f32 %v1699_v47, %v1579_v33 }
 0x53f   :  { %v1735_v27 = vadd.f32 %v1691_v45, %v1575_v8 }
 0x541   :  { %v1707_v59 = vpop.permute.xlu0 %1706 }
 0x542   :  { %v1851_v46 = vpop.permute.xlu1 %1850  ;;  %v1743_v54 = vadd.f32 %v1707_v59, %v1583_v16 }
 0x543   :  { %v4665_v25 = vadd.f32 %v1851_v46, %v1735_v27 }
 0x545   :  { %v1715_v12 = vpop.permute.xlu0 %1714  ;;  %1930 = vrot.lane.b32.xlu1 %v4665_v25, %s3776_s9 }
 0x546   :  { %v1747_v35 = vadd.f32 %v1715_v12, %v1587_v14 }
 0x549   :  { %v1859_v41 = vpop.permute.xlu0 %1858 }
 0x54a   :  { %v4673_v60 = vadd.f32 %v1859_v41, %v1739_v22 }
 0x54c   :  { %1938 = vrot.lane.b32.xlu0 %v4673_v60, %s3776_s9 }
 0x54d   :  { %v1867_v1 = vpop.permute.xlu0 %1866 }
 0x54e   :  { %v4677_v19 = vadd.f32 %v1867_v1, %v1743_v54 }
 0x550   :  { %1946 = vrot.lane.b32.xlu0 %v4677_v19, %s3776_s9 }
 0x551   :  { %v1537_v56 = vpop.permute.xlu0 %1536 }
 0x552   :  { %v1578_v5 = vadd.f32 %v1537_v56, %v1418_v4 }
 0x561   :  { %v1529_v50 = vpop.permute.xlu1 %1528 }
 0x562   :  { %v1574_v53 = vadd.f32 %v1529_v50, %v1414_v40 }
 0x565   :  { %v1545_v17 = vpop.permute.xlu1 %1544 }
 0x566   :  { %v1689_v39 = vpop.permute.xlu0 %1688  ;;  %v1582_v43 = vadd.f32 %v1545_v17, %v1422_v44 }
 0x567   :  { %v1734_v0 = vadd.f32 %v1689_v39, %v1574_v53 }
 0x569   :  { %v1553_v61 = vpop.permute.xlu1 %1552 }
 0x56a   :  { %v1849_v52 = vpop.permute.xlu0 %1848  ;;  %v1586_v10 = vadd.f32 %v1553_v61, %v1426_v6 }
 0x56b   :  { %v4683_v2 = vadd.f32 %v1849_v52, %v1734_v0 }
 0x56d   :  { %1928 = vrot.lane.b32.xlu1 %v4683_v2, %s3776_s9  ;;  %v1697_v3 = vpop.permute.xlu1 %1696 }
 0x56e   :  { %v1738_v51 = vadd.f32 %v1697_v3, %v1578_v5  ;;  %v1875_v57 = vpop.permute.xlu0 %1874 }
 0x56f   :  { %v4699_v45 = vadd.f32 %v1875_v57, %v1747_v35 }
 0x571   :  { %v1705_v58 = vpop.permute.xlu1 %1704 }
 0x572   :  { %v1742_v32 = vadd.f32 %v1705_v58, %v1582_v43 }
 0x575   :  { %v1713_v62 = vpop.permute.xlu1 %1712 }
 0x576   :  { %v1746_v23 = vadd.f32 %v1713_v62, %v1586_v10 }
 0x579   :  { %v1857_v55 = vpop.permute.xlu1 %1856 }
 0x57a   :  { %v4693_v42 = vadd.f32 %v1857_v55, %v1738_v51 }
 0x57c   :  { %1936 = vrot.lane.b32.xlu0 %v4693_v42, %s3776_s9 }
 0x57d   :  { %v1865_v47 = vpop.permute.xlu1 %1864 }
 0x57e   :  { %v4701_v26 = vadd.f32 %v1865_v47, %v1742_v32 }
 0x580   :  { %1954 = vrot.lane.b32.xlu0 %v4699_v45, %s3776_s9  ;;  %1944 = vrot.lane.b32.xlu1 %v4701_v26, %s3776_s9 }
 0x581   :  { %v1873_v37 = vpop.permute.xlu1 %1872 }
 0x582   :  { %v4707_v30 = vadd.f32 %v1873_v37, %v1746_v23 }
 0x584   :  { %1952 = vrot.lane.b32.xlu1 %v4707_v30, %s3776_s9 }
 0x585   :  { %v1927_v18 = vpop.permute.xlu1 %1926 }
 0x586   :  { %v1975_v27 = vsel %vm98_vm0, %v1927_v18, 0.0 }
 0x58c   :  { %v1935_v8 = vpop.permute.xlu0 %1934 }
 0x58d   :  { %v1987_v46 = vsel %vm98_vm0, %v1935_v8, 0.0 }
 0x590   :  { %v1943_v59 = vpop.permute.xlu0 %1942 }
 0x591   :  { %v1999_v12 = vsel %vm98_vm0, %v1943_v59, 0.0 }
 0x594   :  { %v1951_v33 = vpop.permute.xlu0 %1950 }
 0x595   :  { %v2011_v41 = vsel %vm98_vm0, %v1951_v33, 0.0 }
 0x59e   :  { %v1933_v16 = vpop.permute.xlu0 %1932 }
 0x59f   :  { %1976 = vadd.xlane.f32.xlu0 %v1975_v27  ;;  %v1984_v50 = vsel %vm98_vm0, %v1933_v16, 0.0 }
 0x5a3   :  { %1988 = vadd.xlane.f32.xlu0 %v1987_v46 }
 0x5a4   :  { %v1925_v11 = vpop.permute.xlu1 %1924 }
 0x5a5   :  { %v1972_v15 = vsel %vm98_vm0, %v1925_v11, 0.0 }
 0x5a7   :  { %2000 = vadd.xlane.f32.xlu0 %v1999_v12 }
 0x5a8   :  { %1973 = vadd.xlane.f32.xlu1 %v1972_v15  ;;  %v1941_v22 = vpop.permute.xlu1 %1940 }
 0x5a9   :  { %v1996_v54 = vsel %vm98_vm0, %v1941_v22, 0.0 }
 0x5ab   :  { %2012 = vadd.xlane.f32.xlu0 %v2011_v41 }
 0x5ac   :  { %1997 = vadd.xlane.f32.xlu1 %v1996_v54  ;;  %v1949_v1 = vpop.permute.xlu1 %1948 }
 0x5ad   :  { %v2008_v56 = vsel %vm98_vm0, %v1949_v1, 0.0 }
 0x5af   :  { %1985 = vadd.xlane.f32.xlu0 %v1984_v50 }
 0x5b0   :  { %2009 = vadd.xlane.f32.xlu1 %v2008_v56 }
 0x5b7   :  { %v1931_v40 = vpop.permute.xlu1 %1930 }
 0x5b8   :  { %v1981_v17 = vsel %vm98_vm0, %v1931_v40, 0.0 }
 0x5b9   :  { %1982 = vadd.xlane.f32.xlu1 %v1981_v17 }
 0x5be   :  { %v1939_v39 = vpop.permute.xlu0 %1938 }
 0x5bf   :  { %v1993_v53 = vsel %vm98_vm0, %v1939_v39, 0.0 }
 0x5c0   :  { %1994 = vadd.xlane.f32.xlu0 %v1993_v53 }
 0x5c2   :  { %v1947_v0 = vpop.permute.xlu0 %1946 }
 0x5c3   :  { %v2005_v61 = vsel %vm98_vm0, %v1947_v0, 0.0 }
 0x5c4   :  { %2006 = vadd.xlane.f32.xlu0 %v2005_v61 }
 0x5df   :  { %v1929_v52 = vpop.permute.xlu1 %1928 }
 0x5e0   :  { %v1978_v3 = vsel %vm98_vm0, %v1929_v52, 0.0 }
 0x5e1   :  { %1979 = vadd.xlane.f32.xlu1 %v1978_v3 }
 0x5ee   :  { %v1937_v58 = vpop.permute.xlu0 %1936 }
 0x5ef   :  { %v1990_v4 = vsel %vm98_vm0, %v1937_v58, 0.0 }
 0x5f0   :  { %1991 = vadd.xlane.f32.xlu0 %v1990_v4 }
 0x5f2   :  { %v1955_v62 = vpop.permute.xlu0 %1954  ;;  %v1945_v5 = vpop.permute.xlu1 %1944 }
 0x5f3   :  { %v2017_v44 = vsel %vm98_vm0, %v1955_v62, 0.0  ;;  %v2002_v31 = vsel %vm98_vm0, %v1945_v5, 0.0 }
 0x5f4   :  { %2018 = vadd.xlane.f32.xlu0 %v2017_v44  ;;  %2003 = vadd.xlane.f32.xlu1 %v2002_v31 }
 0x5f6   :  { %v1953_v51 = vpop.permute.xlu1 %1952 }
 0x5f7   :  { %v2014_v55 = vsel %vm98_vm0, %v1953_v51, 0.0 }
 0x5f8   :  { %2015 = vadd.xlane.f32.xlu1 %v2014_v55 }
 0x62c   :  { %v1977_v14 = vpop.xlane.xlu0 %1976 }
 0x62d   :  { %v2022_v43 = vmul.f32 0.0625, %v1977_v14 }
 0x62f   :  { %v4728_v57 = vsub.f32 %v4617_v13, %v2022_v43 }
 0x630   :  { %v1989_v6 = vpop.xlane.xlu0 %1988 }
 0x631   :  { %v2054_v35 = vmul.f32 %v4728_v57, %v4728_v57  ;;  %v2026_v32 = vmul.f32 0.0625, %v1989_v6 }
 0x633   :  { %v4733_v47 = vsub.f32 %v4627_v36, %v2026_v32  ;;  %2087 = vrot.lane.b32.xlu1 %v2054_v35, %s3776_s9 }
 0x634   :  { %v2001_v10 = vpop.xlane.xlu0 %2000 }
 0x635   :  { %v2058_v23 = vmul.f32 %v4733_v47, %v4733_v47  ;;  %v2030_v37 = vmul.f32 0.0625, %v2001_v10  ;;  %v1974_v18 = vpop.xlane.xlu1 %1973 }
 0x636   :  { %v2021_v8 = vmul.f32 0.0625, %v1974_v18 }
 0x637   :  { %v4739_v13 = vsub.f32 %v4631_v9, %v2030_v37  ;;  %2095 = vrot.lane.b32.xlu1 %v2058_v23, %s3776_s9 }
 0x638   :  { %v4743_v27 = vsub.f32 %v4651_v38, %v2021_v8  ;;  %v2013_v59 = vpop.xlane.xlu0 %2012 }
 0x639   :  { %v2062_v36 = vmul.f32 %v4739_v13, %v4739_v13  ;;  %v2034_v46 = vmul.f32 0.0625, %v2013_v59  ;;  %v1998_v11 = vpop.xlane.xlu1 %1997 }
 0x63a   :  { %v2053_v12 = vmul.f32 %v4743_v27, %v4743_v27  ;;  %v2029_v33 = vmul.f32 0.0625, %v1998_v11 }
 0x63b   :  { %v4750_v15 = vsub.f32 %v4635_v24, %v2034_v46  ;;  %2103 = vrot.lane.b32.xlu0 %v2062_v36, %s3776_s9 }
 0x63c   :  { %v4754_v9 = vsub.f32 %v4655_v34, %v2029_v33  ;;  %v1986_v38 = vpop.xlane.xlu0 %1985  ;;  %2085 = vrot.lane.b32.xlu1 %v2053_v12, %s3776_s9 }
 0x63d   :  { %v2066_v22 = vmul.f32 %v4750_v15, %v4750_v15  ;;  %v2025_v41 = vmul.f32 0.0625, %v1986_v38  ;;  %v2010_v16 = vpop.xlane.xlu1 %2009 }
 0x63e   :  { %v2061_v54 = vmul.f32 %v4754_v9, %v4754_v9  ;;  %v2033_v1 = vmul.f32 0.0625, %v2010_v16 }
 0x63f   :  { %v4762_v24 = vsub.f32 %v4643_v63, %v2025_v41  ;;  %2111 = vrot.lane.b32.xlu0 %v2066_v22, %s3776_s9 }
 0x640   :  { %v4766_v34 = vsub.f32 %v4659_v48, %v2033_v1  ;;  %2101 = vrot.lane.b32.xlu1 %v2061_v54, %s3776_s9 }
 0x641   :  { %v2057_v50 = vmul.f32 %v4762_v24, %v4762_v24 }
 0x642   :  { %v2065_v56 = vmul.f32 %v4766_v34, %v4766_v34 }
 0x643   :  { %2093 = vrot.lane.b32.xlu0 %v2057_v50, %s3776_s9 }
 0x644   :  { %2109 = vrot.lane.b32.xlu1 %v2065_v56, %s3776_s9 }
 0x646   :  { %v1983_v40 = vpop.xlane.xlu1 %1982 }
 0x647   :  { %v2024_v63 = vmul.f32 0.0625, %v1983_v40 }
 0x649   :  { %v4776_v17 = vsub.f32 %v4665_v25, %v2024_v63 }
 0x64b   :  { %v2056_v48 = vmul.f32 %v4776_v17, %v4776_v17 }
 0x64d   :  { %v1995_v39 = vpop.xlane.xlu0 %1994  ;;  %2091 = vrot.lane.b32.xlu1 %v2056_v48, %s3776_s9 }
 0x64e   :  { %v2028_v53 = vmul.f32 0.0625, %v1995_v39 }
 0x650   :  { %v4782_v0 = vsub.f32 %v4673_v60, %v2028_v53 }
 0x651   :  { %v2007_v61 = vpop.xlane.xlu0 %2006 }
 0x652   :  { %v2060_v52 = vmul.f32 %v4782_v0, %v4782_v0  ;;  %v2032_v3 = vmul.f32 0.0625, %v2007_v61 }
 0x654   :  { %v4787_v58 = vsub.f32 %v4677_v19, %v2032_v3  ;;  %2099 = vrot.lane.b32.xlu0 %v2060_v52, %s3776_s9 }
 0x656   :  { %v2064_v25 = vmul.f32 %v4787_v58, %v4787_v58 }
 0x658   :  { %2107 = vrot.lane.b32.xlu0 %v2064_v25, %s3776_s9 }
 0x66e   :  { %v1980_v4 = vpop.xlane.xlu1 %1979 }
 0x66f   :  { %v2023_v62 = vmul.f32 0.0625, %v1980_v4 }
 0x671   :  { %v4794_v60 = vsub.f32 %v4683_v2, %v2023_v62 }
 0x673   :  { %v2055_v5 = vmul.f32 %v4794_v60, %v4794_v60 }
 0x675   :  { %2089 = vrot.lane.b32.xlu1 %v2055_v5, %s3776_s9 }
 0x67d   :  { %v1992_v44 = vpop.xlane.xlu0 %1991 }
 0x67e   :  { %v2027_v51 = vmul.f32 0.0625, %v1992_v44 }
 0x680   :  { %v4806_v2 = vsub.f32 %v4693_v42, %v2027_v51  ;;  %v4843_v51 = vld [vmem:[%s5105_s2 + $0x10] sm:$0xff] }
 0x681   :  { %v2019_v19 = vpop.xlane.xlu0 %2018  ;;  %v2004_v31 = vpop.xlane.xlu1 %2003 }
 0x682   :  { %v2036_v55 = vmul.f32 0.0625, %v2019_v19  ;;  %v2031_v14 = vmul.f32 0.0625, %v2004_v31  ;;  %v2247_v31 = vsub.s32 3, %v3842_v49 }
 0x684   :  { %v4800_v43 = vsub.f32 %v4699_v45, %v2036_v55  ;;  %v4803_v6 = vsub.f32 %v4701_v26, %v2031_v14  ;;  %v2059_v45 = vmul.f32 %v4806_v2, %v4806_v2  ;;  %v2248_v55 = vrot.slane %v4843_v51, %v2247_v31 }
 0x685   :  { %v2016_v35 = vpop.xlane.xlu1 %2015  ;;  %v2271_v14 = vsub.s32 4, %v3842_v49 }
 0x686   :  { %v2068_v32 = vmul.f32 %v4800_v43, %v4800_v43  ;;  %v2063_v10 = vmul.f32 %v4803_v6, %v4803_v6  ;;  %v2035_v23 = vmul.f32 0.0625, %v2016_v35 }
 0x687   :  { %v2272_v35 = vrot.slane %v4843_v51, %v2271_v14 }
 0x688   :  { %v4813_v37 = vsub.f32 %v4707_v30, %v2035_v23  ;;  %2115 = vrot.lane.b32.xlu0 %v2068_v32, %s3776_s9  ;;  %2105 = vrot.lane.b32.xlu1 %v2063_v10, %s3776_s9 }
 0x68a   :  { %v2067_v42 = vmul.f32 %v4813_v37, %v4813_v37 }
 0x68c   :  { %2097 = vrot.lane.b32.xlu0 %v2059_v45, %s3776_s9  ;;  %2113 = vrot.lane.b32.xlu1 %v2067_v42, %s3776_s9 }
 0x6a5   :  { %v2088_v26 = vpop.permute.xlu1 %2087 }
 0x6a6   :  { %v2136_v8 = vsel %vm98_vm0, %v2088_v26, 0.0 }
 0x6a9   :  { %v2096_v18 = vpop.permute.xlu1 %2095 }
 0x6aa   :  { %v2148_v59 = vsel %vm98_vm0, %v2096_v18, 0.0 }
 0x6ab   :  { %2137 = vadd.xlane.f32.xlu0 %v2136_v8 }
 0x6ad   :  { %v2104_v30 = vpop.permute.xlu0 %2103 }
 0x6ae   :  { %v2086_v36 = vpop.permute.xlu1 %2085  ;;  %v2160_v12 = vsel %vm98_vm0, %v2104_v30, 0.0 }
 0x6af   :  { %v2133_v46 = vsel %vm98_vm0, %v2086_v36, 0.0  ;;  %2149 = vadd.xlane.f32.xlu0 %v2148_v59 }
 0x6b0   :  { %2134 = vadd.xlane.f32.xlu1 %v2133_v46 }
 0x6b1   :  { %v2112_v11 = vpop.permute.xlu0 %2111 }
 0x6b2   :  { %v2102_v33 = vpop.permute.xlu1 %2101  ;;  %v2172_v22 = vsel %vm98_vm0, %v2112_v11, 0.0 }
 0x6b3   :  { %v2157_v38 = vsel %vm98_vm0, %v2102_v33, 0.0  ;;  %2161 = vadd.xlane.f32.xlu0 %v2160_v12 }
 0x6b4   :  { %2158 = vadd.xlane.f32.xlu1 %v2157_v38 }
 0x6b5   :  { %v2094_v16 = vpop.permute.xlu0 %2093 }
 0x6b6   :  { %v2110_v41 = vpop.permute.xlu1 %2109  ;;  %v2145_v1 = vsel %vm98_vm0, %v2094_v16, 0.0 }
 0x6b7   :  { %v2169_v54 = vsel %vm98_vm0, %v2110_v41, 0.0  ;;  %2173 = vadd.xlane.f32.xlu0 %v2172_v22 }
 0x6b8   :  { %2170 = vadd.xlane.f32.xlu1 %v2169_v54 }
 0x6bb   :  { %2146 = vadd.xlane.f32.xlu0 %v2145_v1 }
 0x6bf   :  { %v2092_v50 = vpop.permute.xlu1 %2091 }
 0x6c0   :  { %v2142_v56 = vsel %vm98_vm0, %v2092_v50, 0.0 }
 0x6c1   :  { %2143 = vadd.xlane.f32.xlu1 %v2142_v56 }
 0x6c6   :  { %v2100_v40 = vpop.permute.xlu0 %2099 }
 0x6c7   :  { %v2154_v63 = vsel %vm98_vm0, %v2100_v40, 0.0 }
 0x6c8   :  { %2155 = vadd.xlane.f32.xlu0 %v2154_v63 }
 0x6ca   :  { %v2108_v48 = vpop.permute.xlu0 %2107 }
 0x6cb   :  { %v2166_v39 = vsel %vm98_vm0, %v2108_v48, 0.0 }
 0x6cc   :  { %2167 = vadd.xlane.f32.xlu0 %v2166_v39 }
 0x6e7   :  { %v2090_v53 = vpop.permute.xlu1 %2089 }
 0x6e8   :  { %v2139_v61 = vsel %vm98_vm0, %v2090_v53, 0.0 }
 0x6e9   :  { %2140 = vadd.xlane.f32.xlu1 %v2139_v61 }
 0x6fa   :  { %v2116_v52 = vpop.permute.xlu0 %2115  ;;  %v2106_v3 = vpop.permute.xlu1 %2105 }
 0x6fb   :  { %v2178_v25 = vsel %vm98_vm0, %v2116_v52, 0.0  ;;  %v2163_v4 = vsel %vm98_vm0, %v2106_v3, 0.0 }
 0x6fc   :  { %2179 = vadd.xlane.f32.xlu0 %v2178_v25  ;;  %2164 = vadd.xlane.f32.xlu1 %v2163_v4 }
 0x6fe   :  { %v2098_v62 = vpop.permute.xlu0 %2097  ;;  %v2114_v5 = vpop.permute.xlu1 %2113 }
 0x6ff   :  { %v2151_v44 = vsel %vm98_vm0, %v2098_v62, 0.0  ;;  %v2175_v19 = vsel %vm98_vm0, %v2114_v5, 0.0 }
 0x700   :  { %2152 = vadd.xlane.f32.xlu0 %v2151_v44  ;;  %2176 = vadd.xlane.f32.xlu1 %v2175_v19 }
 0x711   :  { %2250 = vrot.lane.b32.xlu1 %v2248_v55, %s3776_s9 }
 0x716   :  { %2274 = vrot.lane.b32.xlu0 %v2272_v35, %s3776_s9 }
 0x738   :  { %v2138_v32 = vpop.xlane.xlu0 %2137 }
 0x739   :  { %v2182_v8 = vmul.f32 0.0625, %v2138_v32 }
 0x73b   :  { %v2198_v11 = vadd.f32 1e-05, %v2182_v8 }
 0x73c   :  { %v2150_v10 = vpop.xlane.xlu0 %2149 }
 0x73d   :  { %v2135_v45 = vpop.xlane.xlu1 %2134  ;;  %v2186_v30 = vmul.f32 0.0625, %v2150_v10  ;;  %3711 = vrsqrt.f32 %v2198_v11 }
 0x73e   :  { %v2181_v59 = vmul.f32 0.0625, %v2135_v45 }
 0x73f   :  { %v2202_v38 = vadd.f32 1e-05, %v2186_v30 }
 0x740   :  { %v2162_v23 = vpop.xlane.xlu0 %2161  ;;  %v2197_v41 = vadd.f32 1e-05, %v2181_v59 }
 0x741   :  { %v2159_v26 = vpop.xlane.xlu1 %2158  ;;  %v2190_v36 = vmul.f32 0.0625, %v2162_v23  ;;  %3713 = vrsqrt.f32 %v2202_v38 }
 0x742   :  { %v2189_v1 = vmul.f32 0.0625, %v2159_v26  ;;  %3715 = vrsqrt.f32 %v2197_v41 }
 0x743   :  { %v2206_v54 = vadd.f32 1e-05, %v2190_v36 }
 0x744   :  { %v2174_v42 = vpop.xlane.xlu0 %2173  ;;  %v2205_v39 = vadd.f32 1e-05, %v2189_v1 }
 0x745   :  { %v2194_v12 = vmul.f32 0.0625, %v2174_v42  ;;  %v2171_v33 = vpop.xlane.xlu1 %2170  ;;  %3717 = vrsqrt.f32 %v2206_v54 }
 0x746   :  { %v2193_v53 = vmul.f32 0.0625, %v2171_v33 }
 0x747   :  { %v2210_v50 = vadd.f32 1e-05, %v2194_v12  ;;  %v3712_v19 = vpop.eup %3711 }
 0x748   :  { %v2147_v18 = vpop.xlane.xlu0 %2146  ;;  %v2209_v4 = vadd.f32 1e-05, %v2193_v53  ;;  %v2230_v30 = vmul.f32 %v3712_v19, %v4728_v57 }
 0x749   :  { %v2185_v22 = vmul.f32 0.0625, %v2147_v18  ;;  %3719 = vrsqrt.f32 %v2210_v50 }
 0x74b   :  { %v2201_v40 = vadd.f32 1e-05, %v2185_v22  ;;  %v3714_v14 = vpop.eup %3713 }
 0x74c   :  { %v3716_v32 = vpop.eup %3715  ;;  %v2234_v11 = vmul.f32 %v3714_v14, %v4733_v47 }
 0x74d   :  { %3721 = vrsqrt.f32 %v2201_v40  ;;  %v2229_v22 = vmul.f32 %v3716_v32, %v4743_v27 }
 0x74e   :  { %v2144_v56 = vpop.xlane.xlu1 %2143 }
 0x74f   :  { %v2184_v3 = vmul.f32 0.0625, %v2144_v56  ;;  %v3718_v10 = vpop.eup %3717 }
 0x750   :  { %v2238_v12 = vmul.f32 %v3718_v10, %v4739_v13 }
 0x751   :  { %v2200_v31 = vadd.f32 1e-05, %v2184_v3 }
 0x753   :  { %v3720_v26 = vpop.eup %3719 }
 0x754   :  { %v2242_v47 = vmul.f32 %v3720_v26, %v4750_v15 }
 0x755   :  { %v2156_v46 = vpop.xlane.xlu0 %2155 }
 0x756   :  { %v2188_v16 = vmul.f32 0.0625, %v2156_v46 }
 0x757   :  { %v3722_v8 = vpop.eup %3721 }
 0x758   :  { %v2204_v63 = vadd.f32 1e-05, %v2188_v16  ;;  %v2233_v13 = vmul.f32 %v3722_v8, %v4762_v24 }
 0x759   :  { %v2168_v48 = vpop.xlane.xlu0 %2167 }
 0x75a   :  { %v2192_v52 = vmul.f32 0.0625, %v2168_v48  ;;  %3723 = vrsqrt.f32 %v2204_v63  ;;  %v86_v48 = vld [vmem:[%s5105_s2 + $0x18] sm:$0xff] }
 0x75b   :  { %3725 = vrsqrt.f32 %v2205_v39  ;;  %v87_v39 = vld [vmem:[%s5105_s2 + $0x20] sm:$0xff] }
 0x75c   :  { %v2208_v62 = vadd.f32 1e-05, %v2192_v52  ;;  %3727 = vrsqrt.f32 %v2209_v4 }
 0x75e   :  { %3729 = vrsqrt.f32 %v2208_v62 }
 0x75f   :  { %3731 = vrsqrt.f32 %v2200_v31 }
 0x764   :  { %v3724_v59 = vpop.eup %3723 }
 0x765   :  { %v3726_v41 = vpop.eup %3725  ;;  %v2236_v50 = vmul.f32 %v3724_v59, %v4782_v0 }
 0x766   :  { %v2237_v53 = vmul.f32 %v3726_v41, %v4754_v9 }
 0x776   :  { %v2141_v61 = vpop.xlane.xlu1 %2140 }
 0x777   :  { %v2183_v25 = vmul.f32 0.0625, %v2141_v61  ;;  %v3728_v61 = vpop.eup %3727 }
 0x778   :  { %v3730_v62 = vpop.eup %3729 }
 0x779   :  { %v2199_v35 = vadd.f32 1e-05, %v2183_v25  ;;  %v3732_v19 = vpop.eup %3731 }
 0x77a   :  { %v2232_v8 = vmul.f32 %v3732_v19, %v4776_v17 }
 0x77b   :  { %3733 = vrsqrt.f32 %v2199_v35 }
 0x785   :  { %v3734_v9 = vpop.eup %3733 }
 0x789   :  { %v2180_v5 = vpop.xlane.xlu0 %2179  ;;  %v2165_v44 = vpop.xlane.xlu1 %2164 }
 0x78a   :  { %v2196_v55 = vmul.f32 0.0625, %v2180_v5  ;;  %v2191_v36 = vmul.f32 0.0625, %v2165_v44  ;;  %v2401_v5 = vand.u32 4294901760, %v86_v48  ;;  %v2404_v44 = vand.u32 4294901760, %v87_v39 }
 0x78c   :  { %v2212_v23 = vadd.f32 1e-05, %v2196_v55  ;;  %v2207_v56 = vadd.f32 1e-05, %v2191_v36  ;;  %v4884_v32 = vpack.c.bf16 %v2404_v44, %v2401_v5  ;;  %v4892_v59 = vsub.f32 %v87_v39, %v2404_v44  ;;  %v88_v36 = vld [vmem:[%s5105_s2 + $0x28] sm:$0xff] }
 0x78d   :  { %v2153_v45 = vpop.xlane.xlu0 %2152  ;;  %v2177_v42 = vpop.xlane.xlu1 %2176 }
 0x78e   :  { %v2187_v18 = vmul.f32 0.0625, %v2153_v45  ;;  %3735 = vrsqrt.f32 %v2212_v23  ;;  %v2195_v40 = vmul.f32 0.0625, %v2177_v42  ;;  %v2240_v42 = vmul.f32 %v3730_v62, %v4787_v58  ;;  %3496 = vmatprep.subr.bf16.mxu0 %v4884_v32 }
 0x78f   :  { %3498 = vmatpush3.bf16.msra.mxu0 %v4884_v32 }
 0x790   :  { %v2203_v46 = vadd.f32 1e-05, %v2187_v18  ;;  %v2211_v31 = vadd.f32 1e-05, %v2195_v40  ;;  %v2241_v18 = vmul.f32 %v3728_v61, %v4766_v34 }
 0x791   :  { %v4853_v33 = vpop.permute.xlu1 %2250  ;;  %v4855_v38 = vpop.permute.xlu0 %2274 }
 0x792   :  { %3737 = vrsqrt.f32 %v2203_v46  ;;  %v2258_v16 = vmul.f32 %v4853_v33, %v2234_v11  ;;  %v2254_v57 = vmul.f32 %v4853_v33, %v2230_v30  ;;  %v2262_v54 = vmul.f32 %v4853_v33, %v2238_v12  ;;  %v89_v46 = vld [vmem:[%s5105_s2 + $0x30] sm:$0xff]  ;;  %v90_v12 = vld [vmem:[%s5105_s2 + $0x38] sm:$0xff] }
 0x793   :  { %v2253_v1 = vmul.f32 %v4853_v33, %v2229_v22  ;;  %v2266_v24 = vmul.f32 %v4853_v33, %v2242_v47  ;;  %v2257_v0 = vmul.f32 %v4853_v33, %v2233_v13  ;;  %v2260_v4 = vmul.f32 %v4853_v33, %v2236_v50  ;;  %v91_v22 = vld [vmem:[%s5105_s2 + $0x40] sm:$0xff] }
 0x794   :  { %v2282_v27 = vadd.f32 %v4855_v38, %v2258_v16  ;;  %v2278_v63 = vadd.f32 %v4855_v38, %v2254_v57  ;;  %v2286_v15 = vadd.f32 %v4855_v38, %v2262_v54  ;;  %3739 = vrsqrt.f32 %v2207_v56 }
 0x795   :  { %v2277_v25 = vadd.f32 %v4855_v38, %v2253_v1  ;;  %v2261_v55 = vmul.f32 %v4853_v33, %v2237_v53  ;;  %v2290_v14 = vadd.f32 %v4855_v38, %v2266_v24  ;;  %v2281_v35 = vadd.f32 %v4855_v38, %v2257_v0 }
 0x796   :  { %v2298_v52 = vmax.f32 %v2282_v27, 0.0  ;;  %v2294_v3 = vmax.f32 %v2278_v63, 0.0  ;;  %v2302_v10 = vmax.f32 %v2286_v15, 0.0  ;;  %v2284_v45 = vadd.f32 %v4855_v38, %v2260_v4  ;;  %v92_v63 = vld [vmem:[%s5105_s2 + $0x48] sm:$0xff] }
 0x797   :  { %v2293_v23 = vmax.f32 %v2277_v25, 0.0  ;;  %v4890_v30 = vsub.f32 %v86_v48, %v2401_v5  ;;  %3741 = vrsqrt.f32 %v2211_v31  ;;  %v2285_v34 = vadd.f32 %v4855_v38, %v2261_v55  ;;  %v93_v48 = vld [vmem:[%s5105_s2 + $0x50] sm:$0xff]  ;;  %s3777_s2 = smov [#allocation2]  }
 0x798   :  { %2331 = vrot.lane.b32.xlu0 %v2298_v52, %s3769_s25  ;;  %2315 = vrot.lane.b32.xlu1 %v2294_v3, %s3776_s9  ;;  %v3736_v26 = vpop.eup %3735  ;;  %v2264_v17 = vmul.f32 %v4853_v33, %v2240_v42  ;;  %v2231_v11 = vmul.f32 %v3734_v9, %v4794_v60  ;;  %v2306_v41 = vmax.f32 %v2290_v14, 0.0  ;;  %v2297_v16 = vmax.f32 %v2281_v35, 0.0 }
 0x799   :  { %v2265_v57 = vmul.f32 %v4853_v33, %v2241_v18  ;;  %v3527_v54 = vpack.c.bf16 %v4892_v59, %v4890_v30  ;;  %v2300_v1 = vmax.f32 %v2284_v45, 0.0  ;;  %v2407_v47 = vand.u32 4294901760, %v88_v36 }
 0x79a   :  { %v2410_v13 = vand.u32 4294901760, %v89_v46  ;;  %v2256_v50 = vmul.f32 %v4853_v33, %v2232_v8  ;;  %v2244_v56 = vmul.f32 %v3736_v26, %v4800_v43  ;;  %v2413_v40 = vand.u32 4294901760, %v90_v12 }
 0x79b   :  { %3528 = vmatprep.subr.bf16.mxu1 %v3527_v54  ;;  %v2416_v27 = vand.u32 4294901760, %v91_v22  ;;  %v2288_v39 = vadd.f32 %v4855_v38, %v2264_v17  ;;  %v4930_v43 = vsub.f32 %v88_v36, %v2407_v47  ;;  %v2289_v24 = vadd.f32 %v4855_v38, %v2265_v57 }
 0x79c   :  { %v3738_v58 = vpop.eup %3737  ;;  %2347 = vrot.lane.b32.xlu0 %v2302_v10, %s3771_s27  ;;  %2313 = vrot.lane.b32.xlu1 %v2293_v23, %s3776_s9  ;;  %v4928_v15 = vpack.c.bf16 %v2410_v13, %v2407_v47  ;;  %v4933_v0 = vsub.f32 %v89_v46, %v2410_v13  ;;  %v4937_v61 = vsub.f32 %v90_v12, %v2413_v40  ;;  %v2419_v4 = vand.u32 4294901760, %v92_v63 }
 0x79d   :  { %v2235_v60 = vmul.f32 %v3738_v58, %v4806_v2  ;;  %v2301_v2 = vmax.f32 %v2285_v34, 0.0  ;;  %3530 = vmatpush3.bf16.msra.mxu1 %v3527_v54  ;;  %v4935_v53 = vpack.c.bf16 %v2416_v27, %v2413_v40  ;;  %v4940_v25 = vsub.f32 %v91_v22, %v2416_v27 }
 0x79e   :  { %v3740_v52 = vpop.eup %3739  ;;  %3500 = vmatprep.subr.bf16.mxu0 %v4928_v15  ;;  %v2422_v62 = vand.u32 4294901760, %v93_v48  ;;  %v2255_v5 = vmul.f32 %v4853_v33, %v2231_v11  ;;  %v3531_v44 = vpack.c.bf16 %v4933_v0, %v4930_v43  ;;  %v2280_v19 = vadd.f32 %v4855_v38, %v2256_v50 }
 0x79f   :  { %v2259_v3 = vmul.f32 %v4853_v33, %v2235_v60  ;;  %3502 = vmatpush3.bf16.msra.mxu0 %v4928_v15  ;;  %v3535_v31 = vpack.c.bf16 %v4940_v25, %v4937_v61  ;;  %v4952_v55 = vsub.f32 %v92_v63, %v2419_v4  ;;  %v2239_v9 = vmul.f32 %v3740_v52, %v4803_v6 }
 0x7a0   :  { %2363 = vrot.lane.b32.xlu0 %v2306_v41, %s3770_s26  ;;  %2329 = vrot.lane.b32.xlu1 %v2297_v16, %s3769_s25  ;;  %v4955_v14 = vpack.c.bf16 %v2422_v62, %v2419_v4  ;;  %v4957_v35 = vsub.f32 %v93_v48, %v2422_v62  ;;  %v2304_v23 = vmax.f32 %v2288_v39, 0.0  ;;  %v2305_v45 = vmax.f32 %v2289_v24, 0.0 }
 0x7a1   :  { %3532 = vmatprep.subr.bf16.mxu1 %v3531_v44  ;;  %3504 = vmatprep.subr.bf16.mxu0 %v4935_v53  ;;  %v3742_v10 = vpop.eup %3741  ;;  %v2283_v42 = vadd.f32 %v4855_v38, %v2259_v3  ;;  %v2268_v26 = vmul.f32 %v4853_v33, %v2244_v56  ;;  %v2296_v6 = vmax.f32 %v2280_v19, 0.0  ;;  %v2279_v8 = vadd.f32 %v4855_v38, %v2255_v5 }
 0x7a2   :  { %3534 = vmatpush3.bf16.msra.mxu1 %v3531_v44  ;;  %v3539_v18 = vpack.c.bf16 %v4957_v35, %v4952_v55  ;;  %v2263_v58 = vmul.f32 %v4853_v33, %v2239_v9  ;;  %v2243_v34 = vmul.f32 %v3742_v10, %v4813_v37  ;;  %v2516_v17 = vand.u32 4294901760, %v4890_v30 }
 0x7a3   :  { %3536 = vmatprep.subr.bf16.mxu1 %v3535_v31  ;;  %3506 = vmatpush3.bf16.msra.mxu0 %v4935_v53  ;;  %v2299_v36 = vmax.f32 %v2283_v42, 0.0  ;;  %v2292_v46 = vadd.f32 %v4855_v38, %v2268_v26  ;;  %v2523_v11 = vand.u32 4294901760, %v4892_v59  ;;  %v2295_v16 = vmax.f32 %v2279_v8, 0.0 }
 0x7a4   :  { %2335 = vrot.lane.b32.xlu0 %v2300_v1, %s3769_s25  ;;  %2345 = vrot.lane.b32.xlu1 %v2301_v2, %s3771_s27  ;;  %v2517_v12 = vsub.f32 %v4890_v30, %v2516_v17  ;;  %v2287_v37 = vadd.f32 %v4855_v38, %v2263_v58  ;;  %v2267_v57 = vmul.f32 %v4853_v33, %v2243_v34  ;;  %v2530_v60 = vand.u32 4294901760, %v4930_v43 }
 0x7a5   :  { %3508 = vmatprep.subr.bf16.mxu0 %v4955_v14  ;;  %v2524_v22 = vsub.f32 %v4892_v59, %v2523_v11  ;;  %v2308_v41 = vmax.f32 %v2292_v46, 0.0  ;;  %v2537_v47 = vand.u32 4294901760, %v4933_v0  ;;  %v2544_v27 = vand.u32 4294901760, %v4937_v61 }
 0x7a6   :  { %3538 = vmatpush3.bf16.msra.mxu1 %v3535_v31  ;;  %v2518_v54 = vand.u32 4294901760, %v2517_v12  ;;  %v2531_v59 = vsub.f32 %v4930_v43, %v2530_v60  ;;  %v2303_v33 = vmax.f32 %v2287_v37, 0.0  ;;  %v2291_v50 = vadd.f32 %v4855_v38, %v2267_v57 }
 0x7a7   :  { %3540 = vmatprep.subr.bf16.mxu1 %v3539_v18  ;;  %3510 = vmatpush3.bf16.msra.mxu0 %v4955_v14  ;;  %v2525_v1 = vand.u32 4294901760, %v2524_v22  ;;  %v2538_v13 = vsub.f32 %v4933_v0, %v2537_v47  ;;  %v2551_v63 = vand.u32 4294901760, %v4940_v25  ;;  %v4995_v48 = vpack.c.bf16 %v2523_v11, %v2516_v17 }
 0x7a8   :  { %2351 = vrot.lane.b32.xlu0 %v2304_v23, %s3771_s27  ;;  %2361 = vrot.lane.b32.xlu1 %v2305_v45, %s3770_s26  ;;  %v2532_v56 = vand.u32 4294901760, %v2531_v59  ;;  %v2545_v39 = vsub.f32 %v4937_v61, %v2544_v27  ;;  %v2307_v24 = vmax.f32 %v2291_v50, 0.0  ;;  %v2558_v52 = vand.u32 4294901760, %v4952_v55 }
 0x7a9   :  { %v4986_v30 = vpack.c.bf16 %v2525_v1, %v2518_v54  ;;  %v2539_v40 = vand.u32 4294901760, %v2538_v13  ;;  %v2552_v43 = vsub.f32 %v4940_v25, %v2551_v63  ;;  %v2565_v3 = vand.u32 4294901760, %v4957_v35 }
 0x7aa   :  { %3542 = vmatpush3.bf16.msra.mxu1 %v3539_v18  ;;  %v2546_v38 = vand.u32 4294901760, %v2545_v39  ;;  %v2559_v62 = vsub.f32 %v4952_v55, %v2558_v52  ;;  %v5008_v44 = vpack.c.bf16 %v2537_v47, %v2530_v60  ;;  %v5012_v31 = vpack.c.bf16 %v2551_v63, %v2544_v27 }
 0x7ab   :  { %3544 = vmatprep.subr.bf16.mxu1 %v4884_v32  ;;  %3512 = vmatprep.subr.bf16.mxu0 %v4986_v30  ;;  %v4997_v2 = vpack.c.bf16 %v2539_v40, %v2532_v56  ;;  %v2553_v0 = vand.u32 4294901760, %v2552_v43  ;;  %v2566_v5 = vsub.f32 %v4957_v35, %v2565_v3  ;;  %v5014_v9 = vpack.c.bf16 %v2565_v3, %v2558_v52 }
 0x7ac   :  { %2333 = vrot.lane.b32.xlu0 %v2299_v36, %s3769_s25  ;;  %2319 = vrot.lane.b32.xlu1 %v2296_v6, %s3776_s9  ;;  %v2560_v61 = vand.u32 4294901760, %v2559_v62  ;;  %s3160_s25 = sshll.u32 %s3777_s2, 4  ;;  %s3161_s25 = int_to_ptr.vmem [resolvable:$true] %s3160_s25 }
 0x7ad   :  { %v5004_v4 = vpack.c.bf16 %v2553_v0, %v2546_v38  ;;  %v2567_v19 = vand.u32 4294901760, %v2566_v5  ;;  %p3750_p1 = scmp.lt.s32.totalorder %s3161_s25, %s3161_s25 }
 0x7af   :  { %v5010_v25 = vpack.c.bf16 %v2567_v19, %v2560_v61 }
 0x7b0   :  { %2367 = vrot.lane.b32.xlu0 %v2308_v41, %s3770_s26  ;;  %2317 = vrot.lane.b32.xlu1 %v2295_v16, %s3776_s9 }
 0x7b4   :  { %2349 = vrot.lane.b32.xlu1 %v2303_v33, %s3771_s27 }
 0x7b8   :  { %2365 = vrot.lane.b32.xlu1 %v2307_v24, %s3770_s26  ;;  %s3745_s26 = scalar_lea.vmem %s3161_s25, 512 }
 0x7b9   :  { %p3746_p0 = scmp.ne.s32.totalorder %s3161_s25, %s3745_s26  ;;  %p3751_p2 = scmp.lt.s32.totalorder %s3745_s26, %s3745_s26 }
 0x7bb   :  { %p3752_p3 = por %p3751_p2, %p3750_p1 }
 0x7bd   :  { %p3753_p4 = pnand %p3752_p3, %p3746_p0 }
 0x80a   :  { %v2332_v10 = vpop.permute.xlu0 %2331  ;;  %v2316_v23 = vpop.permute.xlu1 %2315 }
 0x80b   :  { %v2374_v55 = vsel %vm98_vm0, %v2316_v23, %v2332_v10 }
 0x80e   :  { %v2348_v45 = vpop.permute.xlu0 %2347  ;;  %v2314_v42 = vpop.permute.xlu1 %2313 }
 0x80f   :  { %v2379_v35 = vsel %vm2377_vm5, %v2374_v55, %v2348_v45 }
 0x812   :  { %v2364_v26 = vpop.permute.xlu0 %2363  ;;  %v2330_v18 = vpop.permute.xlu1 %2329 }
 0x813   :  { %v2384_v6 = vsel %vm2382_vm6, %v2379_v35, %v2364_v26  ;;  %v2373_v34 = vsel %vm98_vm0, %v2314_v42, %v2330_v18 }
 0x814   :  { %v2392_v8 = vsel %vm2387_vm7, %v2384_v6, 0 }
 0x815   :  { %v5020_v36 = vand.u32 4294901760, %v2392_v8 }
 0x816   :  { %v2336_v46 = vpop.permute.xlu0 %2335  ;;  %v2346_v58 = vpop.permute.xlu1 %2345 }
 0x817   :  { %v2484_v17 = vsub.f32 %v2392_v8, %v5020_v36  ;;  %v2378_v11 = vsel %vm2377_vm5, %v2373_v34, %v2346_v58 }
 0x819   :  { %v2485_v57 = vand.u32 4294901760, %v2484_v17 }
 0x81a   :  { %v2352_v12 = vpop.permute.xlu0 %2351  ;;  %v2362_v22 = vpop.permute.xlu1 %2361 }
 0x81b   :  { %v2383_v41 = vsel %vm2382_vm6, %v2378_v11, %v2362_v22  ;;  %v2486_v13 = vsub.f32 %v2484_v17, %v2485_v57 }
 0x81c   :  { %v2389_v16 = vsel %vm2387_vm7, %v2383_v41, 0 }
 0x81d   :  { %v5027_v37 = vand.u32 4294901760, %v2389_v16  ;;  %v2487_v43 = vand.u32 4294901760, %v2486_v13 }
 0x81e   :  { %v2334_v54 = vpop.permute.xlu0 %2333  ;;  %v2320_v1 = vpop.permute.xlu1 %2319 }
 0x81f   :  { %v2474_v60 = vsub.f32 %v2389_v16, %v5027_v37  ;;  %v2376_v47 = vsel %vm98_vm0, %v2320_v1, %v2336_v46 }
 0x820   :  { %v2381_v50 = vsel %vm2377_vm5, %v2376_v47, %v2352_v12 }
 0x821   :  { %3399 = vmatprep.mubr.f32.mxu1 %v2474_v60  ;;  %v2475_v59 = vand.u32 4294901760, %v2474_v60 }
 0x822   :  { %v2368_v33 = vpop.permute.xlu0 %2367  ;;  %3400 = vmatmul.mubr.f32.vlgmr.msra.gmra.mrb[4].mxu1 %v2484_v17  ;;  %v2318_v56 = vpop.permute.xlu1 %2317 }
 0x823   :  { %v2386_v40 = vsel %vm2382_vm6, %v2381_v50, %v2368_v33  ;;  %3546 = vmatpush3.bf16.msra.mxu1 %v4884_v32  ;;  %v2476_v27 = vsub.f32 %v2474_v60, %v2475_v59  ;;  %v2375_v0 = vsel %vm98_vm0, %v2318_v56, %v2334_v54 }
 0x824   :  { %v2398_v63 = vsel %vm2387_vm7, %v2386_v40, 0  ;;  %3548 = vmatprep.subr.bf16.mxu1 %v4928_v15 }
 0x825   :  { %v2477_v39 = vand.u32 4294901760, %v2476_v27  ;;  %v5036_v24 = vand.u32 4294901760, %v2398_v63 }
 0x826   :  { %v2350_v38 = vpop.permute.xlu1 %2349 }
 0x827   :  { %3355 = vmatprep.mubr.f32.mxu0 %v2477_v39  ;;  %3550 = vmatpush3.bf16.msra.mxu1 %v4928_v15  ;;  %v2504_v52 = vsub.f32 %v2398_v63, %v5036_v24  ;;  %v2380_v3 = vsel %vm2377_vm5, %v2375_v0, %v2350_v38 }
 0x828   :  { %3356 = vmatmul.mubr.f32.vlgmr.msra.gmra.mrb[4].mxu0 %v2487_v43  ;;  %3552 = vmatprep.subr.bf16.mxu1 %v4935_v53 }
 0x829   :  { %3514 = vmatpush3.bf16.msra.mxu0 %v4986_v30  ;;  %v2505_v30 = vand.u32 4294901760, %v2504_v52 }
 0x82a   :  { %v2366_v62 = vpop.permute.xlu1 %2365  ;;  %3516 = vmatprep.subr.bf16.mxu0 %v4997_v2 }
 0x82b   :  { %v2385_v5 = vsel %vm2382_vm6, %v2380_v3, %v2366_v62  ;;  %3554 = vmatpush3.bf16.msra.mxu1 %v4935_v53  ;;  %v2506_v45 = vsub.f32 %v2504_v52, %v2505_v30 }
 0x82c   :  { %v2395_v61 = vsel %vm2387_vm7, %v2385_v5, 0  ;;  %3556 = vmatprep.subr.bf16.mxu1 %v4955_v14 }
 0x82d   :  { %v2493_v19 = vand.u32 4294901760, %v2395_v61  ;;  %3518 = vmatpush3.bf16.msra.mxu0 %v4997_v2  ;;  %v2507_v2 = vand.u32 4294901760, %v2506_v45 }
 0x82e   :  { %3520 = vmatprep.subr.bf16.mxu0 %v5004_v4 }
 0x82f   :  { %v2494_v10 = vsub.f32 %v2395_v61, %v2493_v19  ;;  %3558 = vmatpush3.bf16.msra.mxu1 %v4955_v14 }
 0x830   :  { %3560 = vmatprep.subr.bf16.mxu1 %v4995_v48 }
 0x831   :  { %3402 = vmatprep.mubr.f32.mxu1 %v2494_v10  ;;  %3522 = vmatpush3.bf16.msra.mxu0 %v5004_v4  ;;  %v2495_v23 = vand.u32 4294901760, %v2494_v10 }
 0x832   :  { %3403 = vmatmul.mubr.f32.gmra.mrb[6].mxu1 %v2504_v52  ;;  %3524 = vmatprep.subr.bf16.mxu0 %v5010_v25 }
 0x833   :  { %3421 = vmatprep.mubr.f32.mxu1 %v2475_v59  ;;  %v2496_v42 = vsub.f32 %v2494_v10, %v2495_v23 }
 0x835   :  { %v2497_v55 = vand.u32 4294901760, %v2496_v42  ;;  %3526 = vmatpush3.bf16.msra.mxu0 %v5010_v25 }
 0x836   :  { %3422 = vmatmul.mubr.f32.vlgmr.msra.gmra.mrb[4].mxu1 %v2485_v57 }
 0x837   :  { %3562 = vmatpush3.bf16.msra.mxu1 %v4995_v48  ;;  %3358 = vmatprep.mubr.f32.mxu0 %v2497_v55 }
 0x838   :  { %3424 = vmatprep.mubr.f32.mxu1 %v2495_v23  ;;  %3359 = vmatmul.mubr.f32.gmra.mrb[6].mxu0 %v2507_v2 }
 0x839   :  { %3377 = vmatprep.mubr.f32.mxu0 %v5027_v37  ;;  %3564 = vmatprep.subr.bf16.mxu1 %v5008_v44 }
 0x83a   :  { %3425 = vmatmul.mubr.f32.gmra.mrb[6].mxu1 %v2505_v30 }
 0x83b   :  { %3566 = vmatpush3.bf16.msra.mxu1 %v5008_v44  ;;  %3443 = vmatprep.mubr.f32.mxu1 %v5027_v37 }
 0x83c   :  { %3378 = vmatmul.mubr.f32.vlgmr.msra.gmra.mrb[4].mxu0 %v5020_v36  ;;  %3568 = vmatprep.subr.bf16.mxu1 %v5012_v31 }
 0x83d   :  { %3380 = vmatprep.mubr.f32.mxu0 %v2493_v19 }
 0x83f   :  { %3570 = vmatpush3.bf16.msra.mxu1 %v5012_v31 }
 0x840   :  { %3381 = vmatmul.mubr.f32.gmra.mrb[6].mxu0 %v5036_v24  ;;  %3572 = vmatprep.subr.bf16.mxu1 %v5014_v9 }
 0x843   :  { %3574 = vmatpush3.bf16.msra.mxu1 %v5014_v9 }
 0x844   :  { %3576 = vmatprep.subr.bf16.mxu1 %v4884_v32 }
 0x846   :  { %3444 = vmatmul.mubr.f32.vlgmr.msra.gmra.mrb[4].mxu1 %v5020_v36 }
 0x847   :  { %3446 = vmatprep.mubr.f32.mxu1 %v2493_v19  ;;  %3578 = vmatpush3.bf16.msra.mxu1 %v4884_v32 }
 0x848   :  { %3580 = vmatprep.subr.bf16.mxu1 %v4928_v15 }
 0x84a   :  { %3447 = vmatmul.mubr.f32.gmra.mrb[6].mxu1 %v5036_v24 }
 0x84b   :  { %3582 = vmatpush3.bf16.msra.mxu1 %v4928_v15  ;;  %3465 = vmatprep.mubr.f32.mxu1 %v5027_v37  ;;  %v3068_v15 = vsub.s32 5, %v3842_v49 }
 0x84c   :  { %3584 = vmatprep.subr.bf16.mxu1 %v4935_v53 }
 0x84d   :  { %v3069_v25 = vrot.slane %v4843_v51, %v3068_v15 }
 0x84f   :  { %3586 = vmatpush3.bf16.msra.mxu1 %v4935_v53 }
 0x850   :  { %3588 = vmatprep.subr.bf16.mxu1 %v4955_v14 }
 0x853   :  { %3590 = vmatpush3.bf16.msra.mxu1 %v4955_v14 }
 0x856   :  { %3466 = vmatmul.mubr.f32.vlgmr.msra.gmra.mrb[4].mxu1 %v5020_v36 }
 0x857   :  { %3468 = vmatprep.mubr.f32.mxu1 %v2493_v19 }
 0x85a   :  { %3469 = vmatmul.mubr.f32.gmra.mrb[6].mxu1 %v5036_v24 }
 0x90f   :  { %v3379_v32 = vpop.f32.mrb[4].mxu0 }
 0x910   :  { %v2620_v48 = vpop.f32.mrb[5].mxu0 }
 0x913   :  { %v3382_v4 = vpop.f32.mrb[6].mxu0 }
 0x914   :  { %v2632_v44 = vpop.f32.mrb[7].mxu0 }
 0x929   :  { %v3467_v31 = vpop.f32.mrb[4].mxu1 }
 0x92a   :  { %v3599_v9 = vadd.f32 %v3467_v31, %v3379_v32  ;;  %v3044_v53 = vpop.f32.mrb[5].mxu1 }
 0x92b   :  { %v3600_v35 = vadd.f32 %v3044_v53, %v2620_v48 }
 0x92c   :  { %v3071_v26 = vadd.f32 %v3599_v9, %v3069_v25 }
 0x92d   :  { %v3070_v18 = vadd.f32 %v3600_v35, %v3069_v25  ;;  %v3470_v14 = vpop.f32.mrb[6].mxu1 }
 0x92e   :  { %v3601_v6 = vadd.f32 %v3470_v14, %v3382_v4  ;;  %v3056_v8 = vpop.f32.mrb[7].mxu1  ;;  %v3075_v36 = vmax.f32 %v3071_v26, 0.0 }
 0x92f   :  { %v3074_v46 = vmax.f32 %v3070_v18, 0.0  ;;  %v3602_v58 = vadd.f32 %v3056_v8, %v2632_v44 }
 0x930   :  { %v3073_v34 = vadd.f32 %v3601_v6, %v3069_v25  ;;  %v3079_v49 = vadd.f32 %v3075_v36, %v3832_v29 }
 0x931   :  { %v3078_v17 = vadd.f32 %v3074_v46, %v3824_v21  ;;  %v3072_v11 = vadd.f32 %v3602_v58, %v3069_v25 }
 0x932   :  { %v3077_v51 = vmax.f32 %v3073_v34, 0.0  ;;  %v3083_v16 = vmax.f32 %v3079_v49, 0.0 }
 0x933   :  { %v3082_v12 = vmax.f32 %v3078_v17, 0.0  ;;  %v3076_v22 = vmax.f32 %v3072_v11, 0.0 }
 0x934   :  { %v3081_v37 = vadd.f32 %v3077_v51, %v3830_v28 }
 0x935   :  { %v3080_v41 = vadd.f32 %v3076_v22, %v3822_v20  ;;  %3086 = vxpose.xlu1.b32.start [1/2] (short) (narrow) %v3082_v12, 16 }
 0x936   :  { %v3085_v54 = vmax.f32 %v3081_v37, 0.0 }
 0x937   :  { %v3084_v57 = vmax.f32 %v3080_v41, 0.0 }
 0x939   :  { %3087 = vxpose.xlu1.b32.end [2/2] (short) (narrow) %v3083_v16, 16  ;;  %3120 = vxpose.xlu0.b32.start [1/2] (short) (narrow) %v3084_v57, 16 }
 0x93d   :  { %3121 = vxpose.xlu0.b32.end [2/2] (short) (narrow) %v3085_v54, 16 }
 0x966   :  { %3678 = vset.pattern.permute.xlu0 %v3774_v7 }
 0x9b5   :  { %v3102_v21 = vpop.trf.xlu1 }
 0x9b6   :  { %3118 = vst.msk [vmem:[#allocation2] sm:$0xff] %vm98_vm0, %v3102_v21 }
 0x9b9   :  { %v3136_v29 = vpop.trf.xlu0  ;;  %v3103_v1 = vpop.trf.xlu1 }
 0x9ba   :  { %3153 = vst.msk [vmem:[#allocation2 + $0x10] sm:$0xff] %vm98_vm0, %v3136_v29  ;;  %3119 = vst.msk [vmem:[#allocation2 + $0x8] sm:$0xff] %vm98_vm0, %v3103_v1 }
 0x9bd   :  { %v3137_v20 = vpop.trf.xlu0 }
 0x9be   :  { %3154 = vst.msk [vmem:[#allocation2 + $0x18] sm:$0xff] %vm98_vm0, %v3137_v20 }
 0x9bf   :  { %3756 = shalt.err (!%p3753_p4)
}
 0x9c0   :  { %s3757_s4 = scalar_lea.hbm %s5106_s3, 512 }
 0x9c1   :  { %p3758_p5 = scmp.ne.s32.totalorder %s5106_s3, %s3757_s4  ;;  %p3761_p6 = scmp.lt.u32.totalorder %s3757_s4, %s5106_s3 }
 0x9c3   :  { %p3763_p7 = pnand %p3761_p6, %p3758_p5 }
 0x9c5   :  { %3766 = shalt.err (!%p3763_p7)
}
 0x9c6   :  { %s3778_s8 = smov 128   ;;  %s3779_s9 = smov 8  }
 0x9c7   :  { %3166 = dma.vmem_to_hbm [thread:$0]  %s3161_s25, 512, %s5106_s3, [#allocation3], %s3778_s8, %s3778_s8, %s3779_s9  }
 0x9c8   :  { %3767 = dma.done.wait [#allocation3], 512  }
 0x9c9   :  { %3768 = vsyncadd [#allocation3], 4294966784 }
 0x9ca   :  { %3170 = vsyncpa [#allocation3], 1 }

</bundles_post_ra>
